<compile_context>
chip_gen: v7x
topology: tpu7x:2x2x1
jax: 0.10.0
libtpu: 0.0.40
codegen_flags: <defaults>
</compile_context>

<pallas_src>
import jax
import jax.numpy as jnp
from jax.experimental import pallas as pl
from jax.experimental.pallas import tpu as pltpu

LANE = 128
SUBLANE = 8
MAX_TILE_B = 256


def _round_up(x, m):
    return ((x + m - 1) // m) * m


# ----------------------------------------------------------------------------
# Fused kernel: encoder MLP -> reparameterize + KLD -> decoder MLP
# ----------------------------------------------------------------------------
def make_vae_fused_kernel(n_enc_hidden, n_dec_layers, latent_pad):
    """Builds a kernel with a variable number of Linear layers.

    Ref layout (inputs then outputs):
      x, eps,
      (w, b) * n_enc_hidden,       # encoder hidden layers (ReLU)
      w_ml, b_ml,                  # fused final encoder layer: [mean | log-sigma]
      (w, b) * n_dec_layers,       # decoder (ReLU except last)
      rec_out, kld_out
    """

    def kernel(*refs):
        x_ref, eps_ref = refs[0], refs[1]
        idx = 2
        enc_hidden = []
        for _ in range(n_enc_hidden):
            enc_hidden.append((refs[idx], refs[idx + 1]))
            idx += 2
        wml_ref, bml_ref = refs[idx], refs[idx + 1]
        idx += 2
        dec_layers = []
        for _ in range(n_dec_layers):
            dec_layers.append((refs[idx], refs[idx + 1]))
            idx += 2
        rec_ref, kld_ref = refs[idx], refs[idx + 1]

        cdt = wml_ref.dtype  # bf16 compute dtype for MXU operands

        # ---- encoder: (Linear + ReLU) * n_enc_hidden ------------------------
        h = x_ref[...].astype(cdt)
        for w_ref, b_ref in enc_hidden:            # statically unrolled
            a = jnp.dot(h, w_ref[...], preferred_element_type=jnp.float32)
            a = a + b_ref[...]                     # bias (1, out) f32, broadcast
            h = jnp.maximum(a, 0.0).astype(cdt)

        # ---- final encoder layer: fused N = 2*latent_pad GEMM ---------------
        # split at a 128-lane tile boundary -> pure slicing, no lane shuffle.
        ml = jnp.dot(h, wml_ref[...], preferred_element_type=jnp.float32)
        ml = ml + bml_ref[...]
        m = ml[:, :latent_pad]
        logs = ml[:, latent_pad:]

        # ---- reparameterization + KLD ---------------------------------------
        s = jnp.exp(logs)                           # reused: one EUP pass
        eps = eps_ref[...].astype(jnp.float32)
        latents = m + s * eps

        # pad lanes have m = logs = 0, eps = 0 -> contribute exactly 0.
        kld = 0.5 * (m * m + s * s - 2.0 * logs - 1.0)
        kld_sum = jnp.sum(kld, axis=-1, keepdims=True)            # (tile_b, 1)
        # lane-dense store: broadcast across the 128-lane slab, slice outside.
        kld_ref[...] = jnp.broadcast_to(kld_sum, kld_ref.shape).astype(kld_ref.dtype)

        # ---- decoder ---------------------------------------------------------
        h = latents.astype(cdt)
        n_dec = len(dec_layers)
        for li, (w_ref, b_ref) in enumerate(dec_layers):
            a = jnp.dot(h, w_ref[...], preferred_element_type=jnp.float32)
            a = a + b_ref[...]
            if li < n_dec - 1:
                h = jnp.maximum(a, 0.0).astype(cdt)
            else:
                h = a                               # no activation on the last layer
        rec_ref[...] = h.astype(rec_ref.dtype)

    return kernel


# ----------------------------------------------------------------------------
# Parameter construction (deterministic, synthetic, zero-padded to lane tiles)
# ----------------------------------------------------------------------------
def _init_linear(key, fan_in, fan_out, pad_in, pad_out, w_dtype):
    key, kw = jax.random.split(key)
    w = jax.random.normal(kw, (fan_in, fan_out), jnp.float32) * jnp.sqrt(2.0 / fan_in)
    w = jnp.pad(w, ((0, pad_in - fan_in), (0, pad_out - fan_out))).astype(w_dtype)
    b = jnp.zeros((1, pad_out), jnp.float32)        # biases kept f32 (tiny)
    return (w, b), key


class VAE1dPallas:
    def __init__(self, key, input_dim, layers=3, latent_dim=64, interm_dim=1024,
                 weight_dtype=jnp.bfloat16):
        self.input_dim = input_dim
        self.latent_dim = latent_dim
        self.weight_dtype = weight_dtype

        self.input_pad = _round_up(input_dim, LANE)
        self.latent_pad = _round_up(latent_dim, LANE)
        self.interm_pad = _round_up(interm_dim, LANE)

        # encoder: input -> [interm]*layers (ReLU), then one fused
        # interm -> 2*latent head ([mean | log-sigma]); equivalent to the
        # torch module's Linear(interm, 2*latent) followed by torch.split.
        self.enc_hidden = []
        in_d, in_p = input_dim, self.input_pad
        for _ in range(layers):
            lin, key = _init_linear(key, in_d, interm_dim, in_p, self.interm_pad,
                                    weight_dtype)
            self.enc_hidden.append(lin)
            in_d, in_p = interm_dim, self.interm_pad
        (wm, bm), key = _init_linear(key, interm_dim, latent_dim,
                                     self.interm_pad, self.latent_pad, weight_dtype)
        (wl, bl), key = _init_linear(key, interm_dim, latent_dim,
                                     self.interm_pad, self.latent_pad, weight_dtype)
        self.enc_ml = (jnp.concatenate([wm, wl], axis=1),   # (interm_pad, 2*latent_pad)
                       jnp.concatenate([bm, bl], axis=1))   # (1, 2*latent_pad) f32

        # decoder: latent -> [interm]*layers (ReLU) -> input (no activation)
        self.dec_layers = []
        in_d, in_p = latent_dim, self.latent_pad
        for _ in range(layers):
            lin, key = _init_linear(key, in_d, interm_dim, in_p, self.interm_pad,
                                    weight_dtype)
            self.dec_layers.append(lin)
            in_d, in_p = interm_dim, self.interm_pad
        lin, key = _init_linear(key, interm_dim, input_dim, self.interm_pad,
                                self.input_pad, weight_dtype)
        self.dec_layers.append(lin)

        # TODO(synk): loggamma_x is a trainable scalar in the torch module but
        # does not participate in forward(); kept only for parity.
        self.loggamma_x = jnp.zeros((1,), jnp.float32)

        self._kernel = make_vae_fused_kernel(layers, layers + 1, self.latent_pad)

    # ------------------------------------------------------------------ utils
    def _flat_params(self):
        flat = []
        for w, b in self.enc_hidden:
            flat += [w, b]
        flat += [self.enc_ml[0], self.enc_ml[1]]
        for w, b in self.dec_layers:
            flat += [w, b]
        return flat

    @staticmethod
    def _vmem_limit_bytes():
        # Generation-aware limit: keep ~20% headroom for compiler-internal
        # scratch / output double-buffers (matters on v7x's 64 MiB VMEM;
        # resolves to 64 MiB on v5e/v6e's 128 MiB).
        try:
            cap = int(pltpu.get_tpu_info().vmem_capacity_bytes)
        except Exception:
            cap = 128 * 1024 * 1024
        return min(64 * 1024 * 1024, int(cap * 0.8))

    # ---------------------------------------------------------------- forward
    def forward(self, x, eps):
        """x: (batch, input_dim) f32; eps: (batch, latent_dim) f32 (the
        reparameterization noise, generated outside for determinism)."""
        batch = x.shape[0]

        # Batch tiling: cap at 256-row tiles (fills the MXU M dim on v6e/v7x),
        # but ensure >= 2 grid steps when the batch allows it so both v7x
        # TensorCores get work via dimension_semantics=("parallel",).
        batch_pad8 = _round_up(batch, SUBLANE)
        if batch_pad8 > MAX_TILE_B:
            tile_b = MAX_TILE_B   # TODO(synk): drop to 128 on v5e (4x128 MXU).
        elif batch_pad8 > SUBLANE:
            tile_b = _round_up(pl.cdiv(batch_pad8, 2), SUBLANE)
        else:
            tile_b = SUBLANE
        batch_pad = _round_up(batch, tile_b)

        # bf16 x (kernel casts to bf16 anyway -> identical numerics, half the
        # input DMA); jnp.pad instead of a zeros().at[].set() full copy.
        x_p = jnp.pad(x.astype(jnp.bfloat16),
                      ((0, batch_pad - batch),
                       (0, self.input_pad - self.input_dim)))
        eps_p = jnp.pad(eps,
                        ((0, batch_pad - batch),
                         (0, self.latent_pad - self.latent_dim)))

        params = self._flat_params()

        def row_spec(cols):
            return pl.BlockSpec((tile_b, cols), lambda b: (b, 0))

        def const_spec(arr, single_buffer):
            # full-array block, constant index map -> DMA'd once, VMEM-resident
            # across all batch tiles.  Buffered(1): constant blocks gain nothing
            # from double-buffering and it would double weight VMEM.
            if single_buffer:
                return pl.BlockSpec(arr.shape, lambda b: (0, 0),
                                    pipeline_mode=pl.Buffered(1))
            return pl.BlockSpec(arr.shape, lambda b: (0, 0))

        out_shape = (
            jax.ShapeDtypeStruct((batch_pad, self.input_pad), jnp.float32),
            jax.ShapeDtypeStruct((batch_pad, LANE), jnp.float32),
        )
        out_specs = (row_spec(self.input_pad), row_spec(LANE))
        vmem_limit = self._vmem_limit_bytes()

        def run(single_buffer_weights):
            in_specs = [row_spec(self.input_pad), row_spec(self.latent_pad)]
            in_specs += [const_spec(p, single_buffer_weights) for p in params]
            return pl.pallas_call(
                self._kernel,
                out_shape=out_shape,
                grid=(batch_pad // tile_b,),
                in_specs=in_specs,
                out_specs=out_specs,
                compiler_params=pltpu.CompilerParams(
                    dimension_semantics=("parallel",),
                    vmem_limit_bytes=vmem_limit,
                ),
            )(x_p, eps_p, *params)

        try:
            rec_p, kld_p = run(True)
        except Exception:
            # Fallback: default (double) buffering if Buffered(1) is rejected
            # by this jax/Mosaic version.
            rec_p, kld_p = run(False)

        rec = rec_p[:batch, :self.input_dim]
        kld = kld_p[:batch, 0]
        return rec, kld

    # -------------------------------------------------------------- reference
    def reference_forward(self, x, eps):
        """Pure-JAX reference mirroring the kernel's numerics (bf16 operands,
        f32 accumulation) using the same stored weights."""
        cdt = self.weight_dtype

        def dense(h, w, b):
            return jnp.dot(h.astype(cdt).astype(jnp.float32),
                           w.astype(jnp.float32)) + b

        h = jnp.pad(x, ((0, 0), (0, self.input_pad - self.input_dim)))
        for w, b in self.enc_hidden:
            h = jnp.maximum(dense(h, w, b), 0.0)
        ml = dense(h, *self.enc_ml)
        m = ml[:, :self.latent_pad]
        logs = ml[:, self.latent_pad:]

        s = jnp.exp(logs)
        eps_p = jnp.pad(eps, ((0, 0), (0, self.latent_pad - self.latent_dim)))
        lat = m + s * eps_p
        kld = 0.5 * (m * m + s * s - 2.0 * logs - 1.0).sum(-1)

        h = lat
        n_dec = len(self.dec_layers)
        for li, (w, b) in enumerate(self.dec_layers):
            h = dense(h, w, b)
            if li < n_dec - 1:
                h = jnp.maximum(h, 0.0)
        return h[:, :self.input_dim], kld


# ----------------------------------------------------------------------------
# Main
# ----------------------------------------------------------------------------
if __name__ == "__main__":
    key = jax.random.PRNGKey(0)
    k_param, k_x, k_noise = jax.random.split(key, 3)

    # Small shapes consistent with the module (VAE over flat 1-D features).
    batch = 8
    input_dim = 32
    interm_dim = 128
    latent_dim = 16
    n_layers = 3

    model = VAE1dPallas(k_param, input_dim, layers=n_layers,
                        latent_dim=latent_dim, interm_dim=interm_dim)

    x = jax.random.normal(k_x, (batch, input_dim), jnp.float32)
    eps = jax.random.normal(k_noise, (batch, latent_dim), jnp.float32)

    rec, kld = model.forward(x, eps)
    rec = jax.block_until_ready(rec)
    kld = jax.block_until_ready(kld)

    assert rec.shape == (batch, input_dim), rec.shape
    assert kld.shape == (batch,), kld.shape
    assert jnp.all(jnp.isfinite(rec)) and jnp.all(jnp.isfinite(kld))

    rec_ref, kld_ref = model.reference_forward(x, eps)
    assert jnp.allclose(rec, rec_ref, rtol=1e-2, atol=1e-2), \
        float(jnp.max(jnp.abs(rec - rec_ref)))
    assert jnp.allclose(kld, kld_ref, rtol=1e-2, atol=1e-2), \
        float(jnp.max(jnp.abs(kld - kld_ref)))

    print("KERNEL_OK")
</pallas_src>

<mosaic_0001>
module attributes {stable_mosaic.version = 11 : i64} {
  func.func @kernel(%arg0: i32, %arg1: memref<8x128xbf16, #tpu.memory_space<vmem>>, %arg2: memref<8x128xf32, #tpu.memory_space<vmem>>, %arg3: memref<128x128xbf16, #tpu.memory_space<vmem>>, %arg4: memref<1x128xf32, #tpu.memory_space<vmem>>, %arg5: memref<128x128xbf16, #tpu.memory_space<vmem>>, %arg6: memref<1x128xf32, #tpu.memory_space<vmem>>, %arg7: memref<128x128xbf16, #tpu.memory_space<vmem>>, %arg8: memref<1x128xf32, #tpu.memory_space<vmem>>, %arg9: memref<128x256xbf16, #tpu.memory_space<vmem>>, %arg10: memref<1x256xf32, #tpu.memory_space<vmem>>, %arg11: memref<128x128xbf16, #tpu.memory_space<vmem>>, %arg12: memref<1x128xf32, #tpu.memory_space<vmem>>, %arg13: memref<128x128xbf16, #tpu.memory_space<vmem>>, %arg14: memref<1x128xf32, #tpu.memory_space<vmem>>, %arg15: memref<128x128xbf16, #tpu.memory_space<vmem>>, %arg16: memref<1x128xf32, #tpu.memory_space<vmem>>, %arg17: memref<128x128xbf16, #tpu.memory_space<vmem>>, %arg18: memref<1x128xf32, #tpu.memory_space<vmem>>, %arg19: memref<8x128xf32, #tpu.memory_space<vmem>>, %arg20: memref<8x128xf32, #tpu.memory_space<vmem>>) attributes {dimension_semantics = [#tpu.dimension_semantics<parallel>], iteration_bounds = array<i64: 1>, scalar_prefetch = 0 : i64, scratch_operands = 0 : i64, tpu.core_type = #tpu.core_type<tc>, window_params = [{transform_indices = @transform_0, window_bounds = array<i64: 8, 128>}, {transform_indices = @transform_1, window_bounds = array<i64: 8, 128>}, {pipeline_mode = #tpu.pipeline_mode<synchronous>, transform_indices = @transform_2, window_bounds = array<i64: 128, 128>}, {pipeline_mode = #tpu.pipeline_mode<synchronous>, transform_indices = @transform_3, window_bounds = array<i64: 1, 128>}, {pipeline_mode = #tpu.pipeline_mode<synchronous>, transform_indices = @transform_4, window_bounds = array<i64: 128, 128>}, {pipeline_mode = #tpu.pipeline_mode<synchronous>, transform_indices = @transform_5, window_bounds = array<i64: 1, 128>}, {pipeline_mode = #tpu.pipeline_mode<synchronous>, transform_indices = @transform_6, window_bounds = array<i64: 128, 128>}, {pipeline_mode = #tpu.pipeline_mode<synchronous>, transform_indices = @transform_7, window_bounds = array<i64: 1, 128>}, {pipeline_mode = #tpu.pipeline_mode<synchronous>, transform_indices = @transform_8, window_bounds = array<i64: 128, 256>}, {pipeline_mode = #tpu.pipeline_mode<synchronous>, transform_indices = @transform_9, window_bounds = array<i64: 1, 256>}, {pipeline_mode = #tpu.pipeline_mode<synchronous>, transform_indices = @transform_10, window_bounds = array<i64: 128, 128>}, {pipeline_mode = #tpu.pipeline_mode<synchronous>, transform_indices = @transform_11, window_bounds = array<i64: 1, 128>}, {pipeline_mode = #tpu.pipeline_mode<synchronous>, transform_indices = @transform_12, window_bounds = array<i64: 128, 128>}, {pipeline_mode = #tpu.pipeline_mode<synchronous>, transform_indices = @transform_13, window_bounds = array<i64: 1, 128>}, {pipeline_mode = #tpu.pipeline_mode<synchronous>, transform_indices = @transform_14, window_bounds = array<i64: 128, 128>}, {pipeline_mode = #tpu.pipeline_mode<synchronous>, transform_indices = @transform_15, window_bounds = array<i64: 1, 128>}, {pipeline_mode = #tpu.pipeline_mode<synchronous>, transform_indices = @transform_16, window_bounds = array<i64: 128, 128>}, {pipeline_mode = #tpu.pipeline_mode<synchronous>, transform_indices = @transform_17, window_bounds = array<i64: 1, 128>}, {transform_indices = @transform_18, window_bounds = array<i64: 8, 128>}, {transform_indices = @transform_19, window_bounds = array<i64: 8, 128>}]} {
    %c0 = arith.constant 0 : index
    %c0_0 = arith.constant 0 : index
    %0 = vector.load %arg1[%c0, %c0_0] : memref<8x128xbf16, #tpu.memory_space<vmem>>, vector<8x128xbf16>
    %c0_1 = arith.constant 0 : index
    %c0_2 = arith.constant 0 : index
    %1 = vector.load %arg3[%c0_1, %c0_2] : memref<128x128xbf16, #tpu.memory_space<vmem>>, vector<128x128xbf16>
    %cst = arith.constant dense<0.000000e+00> : vector<8x128xf32>
    %2 = tpu.matmul %0, %1, %cst {dimension_numbers = #tpu.dot_dimension_numbers<[1], [0], [0], [1], [0, 0, 1, 1], [], []>} : vector<8x128xbf16>, vector<128x128xbf16>, vector<8x128xf32> -> vector<8x128xf32>
    %c0_3 = arith.constant 0 : index
    %c0_4 = arith.constant 0 : index
    %3 = vector.load %arg4[%c0_3, %c0_4] : memref<1x128xf32, #tpu.memory_space<vmem>>, vector<1x128xf32>
    %4 = vector.broadcast %3 : vector<1x128xf32> to vector<8x128xf32>
    %5 = arith.addf %2, %4 : vector<8x128xf32>
    %cst_5 = arith.constant 0.000000e+00 : f32
    %6 = vector.broadcast %cst_5 : f32 to vector<8x128xf32>
    %7 = arith.maximumf %5, %6 : vector<8x128xf32>
    %8 = arith.truncf %7 : vector<8x128xf32> to vector<8x128xbf16>
    %c0_6 = arith.constant 0 : index
    %c0_7 = arith.constant 0 : index
    %9 = vector.load %arg5[%c0_6, %c0_7] : memref<128x128xbf16, #tpu.memory_space<vmem>>, vector<128x128xbf16>
    %cst_8 = arith.constant dense<0.000000e+00> : vector<8x128xf32>
    %10 = tpu.matmul %8, %9, %cst_8 {dimension_numbers = #tpu.dot_dimension_numbers<[1], [0], [0], [1], [0, 0, 1, 1], [], []>} : vector<8x128xbf16>, vector<128x128xbf16>, vector<8x128xf32> -> vector<8x128xf32>
    %c0_9 = arith.constant 0 : index
    %c0_10 = arith.constant 0 : index
    %11 = vector.load %arg6[%c0_9, %c0_10] : memref<1x128xf32, #tpu.memory_space<vmem>>, vector<1x128xf32>
    %12 = vector.broadcast %11 : vector<1x128xf32> to vector<8x128xf32>
    %13 = arith.addf %10, %12 : vector<8x128xf32>
    %cst_11 = arith.constant 0.000000e+00 : f32
    %14 = vector.broadcast %cst_11 : f32 to vector<8x128xf32>
    %15 = arith.maximumf %13, %14 : vector<8x128xf32>
    %16 = arith.truncf %15 : vector<8x128xf32> to vector<8x128xbf16>
    %c0_12 = arith.constant 0 : index
    %c0_13 = arith.constant 0 : index
    %17 = vector.load %arg7[%c0_12, %c0_13] : memref<128x128xbf16, #tpu.memory_space<vmem>>, vector<128x128xbf16>
    %cst_14 = arith.constant dense<0.000000e+00> : vector<8x128xf32>
    %18 = tpu.matmul %16, %17, %cst_14 {dimension_numbers = #tpu.dot_dimension_numbers<[1], [0], [0], [1], [0, 0, 1, 1], [], []>} : vector<8x128xbf16>, vector<128x128xbf16>, vector<8x128xf32> -> vector<8x128xf32>
    %c0_15 = arith.constant 0 : index
    %c0_16 = arith.constant 0 : index
    %19 = vector.load %arg8[%c0_15, %c0_16] : memref<1x128xf32, #tpu.memory_space<vmem>>, vector<1x128xf32>
    %20 = vector.broadcast %19 : vector<1x128xf32> to vector<8x128xf32>
    %21 = arith.addf %18, %20 : vector<8x128xf32>
    %cst_17 = arith.constant 0.000000e+00 : f32
    %22 = vector.broadcast %cst_17 : f32 to vector<8x128xf32>
    %23 = arith.maximumf %21, %22 : vector<8x128xf32>
    %24 = arith.truncf %23 : vector<8x128xf32> to vector<8x128xbf16>
    %c0_18 = arith.constant 0 : index
    %c0_19 = arith.constant 0 : index
    %25 = vector.load %arg9[%c0_18, %c0_19] : memref<128x256xbf16, #tpu.memory_space<vmem>>, vector<128x256xbf16>
    %cst_20 = arith.constant dense<0.000000e+00> : vector<8x256xf32>
    %26 = tpu.matmul %24, %25, %cst_20 {dimension_numbers = #tpu.dot_dimension_numbers<[1], [0], [0], [1], [0, 0, 1, 1], [], []>} : vector<8x128xbf16>, vector<128x256xbf16>, vector<8x256xf32> -> vector<8x256xf32>
    %c0_21 = arith.constant 0 : index
    %c0_22 = arith.constant 0 : index
    %27 = vector.load %arg10[%c0_21, %c0_22] : memref<1x256xf32, #tpu.memory_space<vmem>>, vector<1x256xf32>
    %28 = vector.broadcast %27 : vector<1x256xf32> to vector<8x256xf32>
    %29 = arith.addf %26, %28 : vector<8x256xf32>
    %30 = vector.extract_strided_slice %29 {offsets = [0, 0], sizes = [8, 128], strides = [1, 1]} : vector<8x256xf32> to vector<8x128xf32>
    %31 = vector.extract_strided_slice %29 {offsets = [0, 128], sizes = [8, 128], strides = [1, 1]} : vector<8x256xf32> to vector<8x128xf32>
    %32 = math.exp %31 : vector<8x128xf32>
    %c0_23 = arith.constant 0 : index
    %c0_24 = arith.constant 0 : index
    %33 = vector.load %arg2[%c0_23, %c0_24] : memref<8x128xf32, #tpu.memory_space<vmem>>, vector<8x128xf32>
    %34 = arith.mulf %32, %33 : vector<8x128xf32>
    %35 = arith.addf %30, %34 : vector<8x128xf32>
    %36 = arith.mulf %30, %30 : vector<8x128xf32>
    %37 = arith.mulf %32, %32 : vector<8x128xf32>
    %38 = arith.addf %36, %37 : vector<8x128xf32>
    %cst_25 = arith.constant 2.000000e+00 : f32
    %39 = vector.broadcast %cst_25 : f32 to vector<8x128xf32>
    %40 = arith.mulf %39, %31 : vector<8x128xf32>
    %41 = arith.subf %38, %40 : vector<8x128xf32>
    %cst_26 = arith.constant 1.000000e+00 : f32
    %42 = vector.broadcast %cst_26 : f32 to vector<8x128xf32>
    %43 = arith.subf %41, %42 : vector<8x128xf32>
    %cst_27 = arith.constant 5.000000e-01 : f32
    %44 = vector.broadcast %cst_27 : f32 to vector<8x128xf32>
    %45 = arith.mulf %44, %43 : vector<8x128xf32>
    %cst_28 = arith.constant dense<0.000000e+00> : vector<8xf32>
    %46 = vector.multi_reduction <add>, %45, %cst_28 [1] : vector<8x128xf32> to vector<8xf32>
    %47 = vector.shape_cast %46 : vector<8xf32> to vector<8x1xf32>
    %48 = vector.shape_cast %47 : vector<8x1xf32> to vector<8x1xf32>
    %49 = vector.broadcast %48 : vector<8x1xf32> to vector<8x128xf32>
    %c0_29 = arith.constant 0 : index
    %c0_30 = arith.constant 0 : index
    %50 = vector.load %arg20[%c0_29, %c0_30] : memref<8x128xf32, #tpu.memory_space<vmem>>, vector<8x128xf32>
    tpu.vector_store %arg20[%c0_29, %c0_30], %49 {strides = array<i32>} : memref<8x128xf32, #tpu.memory_space<vmem>>, vector<8x128xf32>,
    %51 = arith.truncf %35 : vector<8x128xf32> to vector<8x128xbf16>
    %c0_31 = arith.constant 0 : index
    %c0_32 = arith.constant 0 : index
    %52 = vector.load %arg11[%c0_31, %c0_32] : memref<128x128xbf16, #tpu.memory_space<vmem>>, vector<128x128xbf16>
    %cst_33 = arith.constant dense<0.000000e+00> : vector<8x128xf32>
    %53 = tpu.matmul %51, %52, %cst_33 {dimension_numbers = #tpu.dot_dimension_numbers<[1], [0], [0], [1], [0, 0, 1, 1], [], []>} : vector<8x128xbf16>, vector<128x128xbf16>, vector<8x128xf32> -> vector<8x128xf32>
    %c0_34 = arith.constant 0 : index
    %c0_35 = arith.constant 0 : index
    %54 = vector.load %arg12[%c0_34, %c0_35] : memref<1x128xf32, #tpu.memory_space<vmem>>, vector<1x128xf32>
    %55 = vector.broadcast %54 : vector<1x128xf32> to vector<8x128xf32>
    %56 = arith.addf %53, %55 : vector<8x128xf32>
    %cst_36 = arith.constant 0.000000e+00 : f32
    %57 = vector.broadcast %cst_36 : f32 to vector<8x128xf32>
    %58 = arith.maximumf %56, %57 : vector<8x128xf32>
    %59 = arith.truncf %58 : vector<8x128xf32> to vector<8x128xbf16>
    %c0_37 = arith.constant 0 : index
    %c0_38 = arith.constant 0 : index
    %60 = vector.load %arg13[%c0_37, %c0_38] : memref<128x128xbf16, #tpu.memory_space<vmem>>, vector<128x128xbf16>
    %cst_39 = arith.constant dense<0.000000e+00> : vector<8x128xf32>
    %61 = tpu.matmul %59, %60, %cst_39 {dimension_numbers = #tpu.dot_dimension_numbers<[1], [0], [0], [1], [0, 0, 1, 1], [], []>} : vector<8x128xbf16>, vector<128x128xbf16>, vector<8x128xf32> -> vector<8x128xf32>
    %c0_40 = arith.constant 0 : index
    %c0_41 = arith.constant 0 : index
    %62 = vector.load %arg14[%c0_40, %c0_41] : memref<1x128xf32, #tpu.memory_space<vmem>>, vector<1x128xf32>
    %63 = vector.broadcast %62 : vector<1x128xf32> to vector<8x128xf32>
    %64 = arith.addf %61, %63 : vector<8x128xf32>
    %cst_42 = arith.constant 0.000000e+00 : f32
    %65 = vector.broadcast %cst_42 : f32 to vector<8x128xf32>
    %66 = arith.maximumf %64, %65 : vector<8x128xf32>
    %67 = arith.truncf %66 : vector<8x128xf32> to vector<8x128xbf16>
    %c0_43 = arith.constant 0 : index
    %c0_44 = arith.constant 0 : index
    %68 = vector.load %arg15[%c0_43, %c0_44] : memref<128x128xbf16, #tpu.memory_space<vmem>>, vector<128x128xbf16>
    %cst_45 = arith.constant dense<0.000000e+00> : vector<8x128xf32>
    %69 = tpu.matmul %67, %68, %cst_45 {dimension_numbers = #tpu.dot_dimension_numbers<[1], [0], [0], [1], [0, 0, 1, 1], [], []>} : vector<8x128xbf16>, vector<128x128xbf16>, vector<8x128xf32> -> vector<8x128xf32>
    %c0_46 = arith.constant 0 : index
    %c0_47 = arith.constant 0 : index
    %70 = vector.load %arg16[%c0_46, %c0_47] : memref<1x128xf32, #tpu.memory_space<vmem>>, vector<1x128xf32>
    %71 = vector.broadcast %70 : vector<1x128xf32> to vector<8x128xf32>
    %72 = arith.addf %69, %71 : vector<8x128xf32>
    %cst_48 = arith.constant 0.000000e+00 : f32
    %73 = vector.broadcast %cst_48 : f32 to vector<8x128xf32>
    %74 = arith.maximumf %72, %73 : vector<8x128xf32>
    %75 = arith.truncf %74 : vector<8x128xf32> to vector<8x128xbf16>
    %c0_49 = arith.constant 0 : index
    %c0_50 = arith.constant 0 : index
    %76 = vector.load %arg17[%c0_49, %c0_50] : memref<128x128xbf16, #tpu.memory_space<vmem>>, vector<128x128xbf16>
    %cst_51 = arith.constant dense<0.000000e+00> : vector<8x128xf32>
    %77 = tpu.matmul %75, %76, %cst_51 {dimension_numbers = #tpu.dot_dimension_numbers<[1], [0], [0], [1], [0, 0, 1, 1], [], []>} : vector<8x128xbf16>, vector<128x128xbf16>, vector<8x128xf32> -> vector<8x128xf32>
    %c0_52 = arith.constant 0 : index
    %c0_53 = arith.constant 0 : index
    %78 = vector.load %arg18[%c0_52, %c0_53] : memref<1x128xf32, #tpu.memory_space<vmem>>, vector<1x128xf32>
    %79 = vector.broadcast %78 : vector<1x128xf32> to vector<8x128xf32>
    %80 = arith.addf %77, %79 : vector<8x128xf32>
    %c0_54 = arith.constant 0 : index
    %c0_55 = arith.constant 0 : index
    %81 = vector.load %arg19[%c0_54, %c0_55] : memref<8x128xf32, #tpu.memory_space<vmem>>, vector<8x128xf32>
    tpu.vector_store %arg19[%c0_54, %c0_55], %80 {strides = array<i32>} : memref<8x128xf32, #tpu.memory_space<vmem>>, vector<8x128xf32>,
    return
  }
  func.func @transform_0(%arg0: i32) -> (i32, i32) {
    %c0_i32 = arith.constant 0 : i32
    %c0_i32_0 = arith.constant 0 : i32
    return %arg0, %c0_i32 : i32, i32
  }
  func.func @transform_1(%arg0: i32) -> (i32, i32) {
    %c0_i32 = arith.constant 0 : i32
    %c0_i32_0 = arith.constant 0 : i32
    return %arg0, %c0_i32 : i32, i32
  }
  func.func @transform_2(%arg0: i32) -> (i32, i32) {
    %c0_i32 = arith.constant 0 : i32
    %c0_i32_0 = arith.constant 0 : i32
    %c0_i32_1 = arith.constant 0 : i32
    return %c0_i32, %c0_i32_0 : i32, i32
  }
  func.func @transform_3(%arg0: i32) -> (i32, i32) {
    %c0_i32 = arith.constant 0 : i32
    %c0_i32_0 = arith.constant 0 : i32
    %c0_i32_1 = arith.constant 0 : i32
    return %c0_i32, %c0_i32_0 : i32, i32
  }
  func.func @transform_4(%arg0: i32) -> (i32, i32) {
    %c0_i32 = arith.constant 0 : i32
    %c0_i32_0 = arith.constant 0 : i32
    %c0_i32_1 = arith.constant 0 : i32
    return %c0_i32, %c0_i32_0 : i32, i32
  }
  func.func @transform_5(%arg0: i32) -> (i32, i32) {
    %c0_i32 = arith.constant 0 : i32
    %c0_i32_0 = arith.constant 0 : i32
    %c0_i32_1 = arith.constant 0 : i32
    return %c0_i32, %c0_i32_0 : i32, i32
  }
  func.func @transform_6(%arg0: i32) -> (i32, i32) {
    %c0_i32 = arith.constant 0 : i32
    %c0_i32_0 = arith.constant 0 : i32
    %c0_i32_1 = arith.constant 0 : i32
    return %c0_i32, %c0_i32_0 : i32, i32
  }
  func.func @transform_7(%arg0: i32) -> (i32, i32) {
    %c0_i32 = arith.constant 0 : i32
    %c0_i32_0 = arith.constant 0 : i32
    %c0_i32_1 = arith.constant 0 : i32
    return %c0_i32, %c0_i32_0 : i32, i32
  }
  func.func @transform_8(%arg0: i32) -> (i32, i32) {
    %c0_i32 = arith.constant 0 : i32
    %c0_i32_0 = arith.constant 0 : i32
    %c0_i32_1 = arith.constant 0 : i32
    return %c0_i32, %c0_i32_0 : i32, i32
  }
  func.func @transform_9(%arg0: i32) -> (i32, i32) {
    %c0_i32 = arith.constant 0 : i32
    %c0_i32_0 = arith.constant 0 : i32
    %c0_i32_1 = arith.constant 0 : i32
    return %c0_i32, %c0_i32_0 : i32, i32
  }
  func.func @transform_10(%arg0: i32) -> (i32, i32) {
    %c0_i32 = arith.constant 0 : i32
    %c0_i32_0 = arith.constant 0 : i32
    %c0_i32_1 = arith.constant 0 : i32
    return %c0_i32, %c0_i32_0 : i32, i32
  }
  func.func @transform_11(%arg0: i32) -> (i32, i32) {
    %c0_i32 = arith.constant 0 : i32
    %c0_i32_0 = arith.constant 0 : i32
    %c0_i32_1 = arith.constant 0 : i32
    return %c0_i32, %c0_i32_0 : i32, i32
  }
  func.func @transform_12(%arg0: i32) -> (i32, i32) {
    %c0_i32 = arith.constant 0 : i32
    %c0_i32_0 = arith.constant 0 : i32
    %c0_i32_1 = arith.constant 0 : i32
    return %c0_i32, %c0_i32_0 : i32, i32
  }
  func.func @transform_13(%arg0: i32) -> (i32, i32) {
    %c0_i32 = arith.constant 0 : i32
    %c0_i32_0 = arith.constant 0 : i32
    %c0_i32_1 = arith.constant 0 : i32
    return %c0_i32, %c0_i32_0 : i32, i32
  }
  func.func @transform_14(%arg0: i32) -> (i32, i32) {
    %c0_i32 = arith.constant 0 : i32
    %c0_i32_0 = arith.constant 0 : i32
    %c0_i32_1 = arith.constant 0 : i32
    return %c0_i32, %c0_i32_0 : i32, i32
  }
  func.func @transform_15(%arg0: i32) -> (i32, i32) {
    %c0_i32 = arith.constant 0 : i32
    %c0_i32_0 = arith.constant 0 : i32
    %c0_i32_1 = arith.constant 0 : i32
    return %c0_i32, %c0_i32_0 : i32, i32
  }
  func.func @transform_16(%arg0: i32) -> (i32, i32) {
    %c0_i32 = arith.constant 0 : i32
    %c0_i32_0 = arith.constant 0 : i32
    %c0_i32_1 = arith.constant 0 : i32
    return %c0_i32, %c0_i32_0 : i32, i32
  }
  func.func @transform_17(%arg0: i32) -> (i32, i32) {
    %c0_i32 = arith.constant 0 : i32
    %c0_i32_0 = arith.constant 0 : i32
    %c0_i32_1 = arith.constant 0 : i32
    return %c0_i32, %c0_i32_0 : i32, i32
  }
  func.func @transform_18(%arg0: i32) -> (i32, i32) {
    %c0_i32 = arith.constant 0 : i32
    %c0_i32_0 = arith.constant 0 : i32
    return %arg0, %c0_i32 : i32, i32
  }
  func.func @transform_19(%arg0: i32) -> (i32, i32) {
    %c0_i32 = arith.constant 0 : i32
    %c0_i32_0 = arith.constant 0 : i32
    return %arg0, %c0_i32 : i32, i32
  }
}

module attributes {stable_mosaic.version = 11 : i64} {
  func.func @kernel(%arg0: i32, %arg1: memref<8x128xbf16, #tpu.memory_space<vmem>>, %arg2: memref<8x128xf32, #tpu.memory_space<vmem>>, %arg3: memref<128x128xbf16, #tpu.memory_space<vmem>>, %arg4: memref<1x128xf32, #tpu.memory_space<vmem>>, %arg5: memref<128x128xbf16, #tpu.memory_space<vmem>>, %arg6: memref<1x128xf32, #tpu.memory_space<vmem>>, %arg7: memref<128x128xbf16, #tpu.memory_space<vmem>>, %arg8: memref<1x128xf32, #tpu.memory_space<vmem>>, %arg9: memref<128x256xbf16, #tpu.memory_space<vmem>>, %arg10: memref<1x256xf32, #tpu.memory_space<vmem>>, %arg11: memref<128x128xbf16, #tpu.memory_space<vmem>>, %arg12: memref<1x128xf32, #tpu.memory_space<vmem>>, %arg13: memref<128x128xbf16, #tpu.memory_space<vmem>>, %arg14: memref<1x128xf32, #tpu.memory_space<vmem>>, %arg15: memref<128x128xbf16, #tpu.memory_space<vmem>>, %arg16: memref<1x128xf32, #tpu.memory_space<vmem>>, %arg17: memref<128x128xbf16, #tpu.memory_space<vmem>>, %arg18: memref<1x128xf32, #tpu.memory_space<vmem>>, %arg19: memref<8x128xf32, #tpu.memory_space<vmem>>, %arg20: memref<8x128xf32, #tpu.memory_space<vmem>>) attributes {dimension_semantics = [#tpu.dimension_semantics<parallel>], iteration_bounds = array<i64: 1>, scalar_prefetch = 0 : i64, scratch_operands = 0 : i64, tpu.core_type = #tpu.core_type<tc>, window_params = [{transform_indices = @transform_0, window_bounds = array<i64: 8, 128>}, {transform_indices = @transform_1, window_bounds = array<i64: 8, 128>}, {pipeline_mode = #tpu.pipeline_mode<synchronous>, transform_indices = @transform_2, window_bounds = array<i64: 128, 128>}, {pipeline_mode = #tpu.pipeline_mode<synchronous>, transform_indices = @transform_3, window_bounds = array<i64: 1, 128>}, {pipeline_mode = #tpu.pipeline_mode<synchronous>, transform_indices = @transform_4, window_bounds = array<i64: 128, 128>}, {pipeline_mode = #tpu.pipeline_mode<synchronous>, transform_indices = @transform_5, window_bounds = array<i64: 1, 128>}, {pipeline_mode = #tpu.pipeline_mode<synchronous>, transform_indices = @transform_6, window_bounds = array<i64: 128, 128>}, {pipeline_mode = #tpu.pipeline_mode<synchronous>, transform_indices = @transform_7, window_bounds = array<i64: 1, 128>}, {pipeline_mode = #tpu.pipeline_mode<synchronous>, transform_indices = @transform_8, window_bounds = array<i64: 128, 256>}, {pipeline_mode = #tpu.pipeline_mode<synchronous>, transform_indices = @transform_9, window_bounds = array<i64: 1, 256>}, {pipeline_mode = #tpu.pipeline_mode<synchronous>, transform_indices = @transform_10, window_bounds = array<i64: 128, 128>}, {pipeline_mode = #tpu.pipeline_mode<synchronous>, transform_indices = @transform_11, window_bounds = array<i64: 1, 128>}, {pipeline_mode = #tpu.pipeline_mode<synchronous>, transform_indices = @transform_12, window_bounds = array<i64: 128, 128>}, {pipeline_mode = #tpu.pipeline_mode<synchronous>, transform_indices = @transform_13, window_bounds = array<i64: 1, 128>}, {pipeline_mode = #tpu.pipeline_mode<synchronous>, transform_indices = @transform_14, window_bounds = array<i64: 128, 128>}, {pipeline_mode = #tpu.pipeline_mode<synchronous>, transform_indices = @transform_15, window_bounds = array<i64: 1, 128>}, {pipeline_mode = #tpu.pipeline_mode<synchronous>, transform_indices = @transform_16, window_bounds = array<i64: 128, 128>}, {pipeline_mode = #tpu.pipeline_mode<synchronous>, transform_indices = @transform_17, window_bounds = array<i64: 1, 128>}, {transform_indices = @transform_18, window_bounds = array<i64: 8, 128>}, {transform_indices = @transform_19, window_bounds = array<i64: 8, 128>}]} {
    %c0 = arith.constant 0 : index
    %c0_0 = arith.constant 0 : index
    %0 = vector.load %arg1[%c0, %c0_0] : memref<8x128xbf16, #tpu.memory_space<vmem>>, vector<8x128xbf16>
    %c0_1 = arith.constant 0 : index
    %c0_2 = arith.constant 0 : index
    %1 = vector.load %arg3[%c0_1, %c0_2] : memref<128x128xbf16, #tpu.memory_space<vmem>>, vector<128x128xbf16>
    %cst = arith.constant dense<0.000000e+00> : vector<8x128xf32>
    %2 = tpu.matmul %0, %1, %cst {dimension_numbers = #tpu.dot_dimension_numbers<[1], [0], [0], [1], [0, 0, 1, 1], [], []>} : vector<8x128xbf16>, vector<128x128xbf16>, vector<8x128xf32> -> vector<8x128xf32>
    %c0_3 = arith.constant 0 : index
    %c0_4 = arith.constant 0 : index
    %3 = vector.load %arg4[%c0_3, %c0_4] : memref<1x128xf32, #tpu.memory_space<vmem>>, vector<1x128xf32>
    %4 = vector.broadcast %3 : vector<1x128xf32> to vector<8x128xf32>
    %5 = arith.addf %2, %4 : vector<8x128xf32>
    %cst_5 = arith.constant 0.000000e+00 : f32
    %6 = vector.broadcast %cst_5 : f32 to vector<8x128xf32>
    %7 = arith.maximumf %5, %6 : vector<8x128xf32>
    %8 = arith.truncf %7 : vector<8x128xf32> to vector<8x128xbf16>
    %c0_6 = arith.constant 0 : index
    %c0_7 = arith.constant 0 : index
    %9 = vector.load %arg5[%c0_6, %c0_7] : memref<128x128xbf16, #tpu.memory_space<vmem>>, vector<128x128xbf16>
    %cst_8 = arith.constant dense<0.000000e+00> : vector<8x128xf32>
    %10 = tpu.matmul %8, %9, %cst_8 {dimension_numbers = #tpu.dot_dimension_numbers<[1], [0], [0], [1], [0, 0, 1, 1], [], []>} : vector<8x128xbf16>, vector<128x128xbf16>, vector<8x128xf32> -> vector<8x128xf32>
    %c0_9 = arith.constant 0 : index
    %c0_10 = arith.constant 0 : index
    %11 = vector.load %arg6[%c0_9, %c0_10] : memref<1x128xf32, #tpu.memory_space<vmem>>, vector<1x128xf32>
    %12 = vector.broadcast %11 : vector<1x128xf32> to vector<8x128xf32>
    %13 = arith.addf %10, %12 : vector<8x128xf32>
    %cst_11 = arith.constant 0.000000e+00 : f32
    %14 = vector.broadcast %cst_11 : f32 to vector<8x128xf32>
    %15 = arith.maximumf %13, %14 : vector<8x128xf32>
    %16 = arith.truncf %15 : vector<8x128xf32> to vector<8x128xbf16>
    %c0_12 = arith.constant 0 : index
    %c0_13 = arith.constant 0 : index
    %17 = vector.load %arg7[%c0_12, %c0_13] : memref<128x128xbf16, #tpu.memory_space<vmem>>, vector<128x128xbf16>
    %cst_14 = arith.constant dense<0.000000e+00> : vector<8x128xf32>
    %18 = tpu.matmul %16, %17, %cst_14 {dimension_numbers = #tpu.dot_dimension_numbers<[1], [0], [0], [1], [0, 0, 1, 1], [], []>} : vector<8x128xbf16>, vector<128x128xbf16>, vector<8x128xf32> -> vector<8x128xf32>
    %c0_15 = arith.constant 0 : index
    %c0_16 = arith.constant 0 : index
    %19 = vector.load %arg8[%c0_15, %c0_16] : memref<1x128xf32, #tpu.memory_space<vmem>>, vector<1x128xf32>
    %20 = vector.broadcast %19 : vector<1x128xf32> to vector<8x128xf32>
    %21 = arith.addf %18, %20 : vector<8x128xf32>
    %cst_17 = arith.constant 0.000000e+00 : f32
    %22 = vector.broadcast %cst_17 : f32 to vector<8x128xf32>
    %23 = arith.maximumf %21, %22 : vector<8x128xf32>
    %24 = arith.truncf %23 : vector<8x128xf32> to vector<8x128xbf16>
    %c0_18 = arith.constant 0 : index
    %c0_19 = arith.constant 0 : index
    %25 = vector.load %arg9[%c0_18, %c0_19] : memref<128x256xbf16, #tpu.memory_space<vmem>>, vector<128x256xbf16>
    %cst_20 = arith.constant dense<0.000000e+00> : vector<8x256xf32>
    %26 = tpu.matmul %24, %25, %cst_20 {dimension_numbers = #tpu.dot_dimension_numbers<[1], [0], [0], [1], [0, 0, 1, 1], [], []>} : vector<8x128xbf16>, vector<128x256xbf16>, vector<8x256xf32> -> vector<8x256xf32>
    %c0_21 = arith.constant 0 : index
    %c0_22 = arith.constant 0 : index
    %27 = vector.load %arg10[%c0_21, %c0_22] : memref<1x256xf32, #tpu.memory_space<vmem>>, vector<1x256xf32>
    %28 = vector.broadcast %27 : vector<1x256xf32> to vector<8x256xf32>
    %29 = arith.addf %26, %28 : vector<8x256xf32>
    %30 = vector.extract_strided_slice %29 {offsets = [0, 0], sizes = [8, 128], strides = [1, 1]} : vector<8x256xf32> to vector<8x128xf32>
    %31 = vector.extract_strided_slice %29 {offsets = [0, 128], sizes = [8, 128], strides = [1, 1]} : vector<8x256xf32> to vector<8x128xf32>
    %32 = math.exp %31 : vector<8x128xf32>
    %c0_23 = arith.constant 0 : index
    %c0_24 = arith.constant 0 : index
    %33 = vector.load %arg2[%c0_23, %c0_24] : memref<8x128xf32, #tpu.memory_space<vmem>>, vector<8x128xf32>
    %34 = arith.mulf %32, %33 : vector<8x128xf32>
    %35 = arith.addf %30, %34 : vector<8x128xf32>
    %36 = arith.mulf %30, %30 : vector<8x128xf32>
    %37 = arith.mulf %32, %32 : vector<8x128xf32>
    %38 = arith.addf %36, %37 : vector<8x128xf32>
    %cst_25 = arith.constant 2.000000e+00 : f32
    %39 = vector.broadcast %cst_25 : f32 to vector<8x128xf32>
    %40 = arith.mulf %39, %31 : vector<8x128xf32>
    %41 = arith.subf %38, %40 : vector<8x128xf32>
    %cst_26 = arith.constant 1.000000e+00 : f32
    %42 = vector.broadcast %cst_26 : f32 to vector<8x128xf32>
    %43 = arith.subf %41, %42 : vector<8x128xf32>
    %cst_27 = arith.constant 5.000000e-01 : f32
    %44 = vector.broadcast %cst_27 : f32 to vector<8x128xf32>
    %45 = arith.mulf %44, %43 : vector<8x128xf32>
    %cst_28 = arith.constant dense<0.000000e+00> : vector<8xf32>
    %46 = vector.multi_reduction <add>, %45, %cst_28 [1] : vector<8x128xf32> to vector<8xf32>
    %47 = vector.shape_cast %46 : vector<8xf32> to vector<8x1xf32>
    %48 = vector.shape_cast %47 : vector<8x1xf32> to vector<8x1xf32>
    %49 = vector.broadcast %48 : vector<8x1xf32> to vector<8x128xf32>
    %c0_29 = arith.constant 0 : index
    %c0_30 = arith.constant 0 : index
    %50 = vector.load %arg20[%c0_29, %c0_30] : memref<8x128xf32, #tpu.memory_space<vmem>>, vector<8x128xf32>
    tpu.vector_store %arg20[%c0_29, %c0_30], %49 {strides = array<i32>} : memref<8x128xf32, #tpu.memory_space<vmem>>, vector<8x128xf32>,
    %51 = arith.truncf %35 : vector<8x128xf32> to vector<8x128xbf16>
    %c0_31 = arith.constant 0 : index
    %c0_32 = arith.constant 0 : index
    %52 = vector.load %arg11[%c0_31, %c0_32] : memref<128x128xbf16, #tpu.memory_space<vmem>>, vector<128x128xbf16>
    %cst_33 = arith.constant dense<0.000000e+00> : vector<8x128xf32>
    %53 = tpu.matmul %51, %52, %cst_33 {dimension_numbers = #tpu.dot_dimension_numbers<[1], [0], [0], [1], [0, 0, 1, 1], [], []>} : vector<8x128xbf16>, vector<128x128xbf16>, vector<8x128xf32> -> vector<8x128xf32>
    %c0_34 = arith.constant 0 : index
    %c0_35 = arith.constant 0 : index
    %54 = vector.load %arg12[%c0_34, %c0_35] : memref<1x128xf32, #tpu.memory_space<vmem>>, vector<1x128xf32>
    %55 = vector.broadcast %54 : vector<1x128xf32> to vector<8x128xf32>
    %56 = arith.addf %53, %55 : vector<8x128xf32>
    %cst_36 = arith.constant 0.000000e+00 : f32
    %57 = vector.broadcast %cst_36 : f32 to vector<8x128xf32>
    %58 = arith.maximumf %56, %57 : vector<8x128xf32>
    %59 = arith.truncf %58 : vector<8x128xf32> to vector<8x128xbf16>
    %c0_37 = arith.constant 0 : index
    %c0_38 = arith.constant 0 : index
    %60 = vector.load %arg13[%c0_37, %c0_38] : memref<128x128xbf16, #tpu.memory_space<vmem>>, vector<128x128xbf16>
    %cst_39 = arith.constant dense<0.000000e+00> : vector<8x128xf32>
    %61 = tpu.matmul %59, %60, %cst_39 {dimension_numbers = #tpu.dot_dimension_numbers<[1], [0], [0], [1], [0, 0, 1, 1], [], []>} : vector<8x128xbf16>, vector<128x128xbf16>, vector<8x128xf32> -> vector<8x128xf32>
    %c0_40 = arith.constant 0 : index
    %c0_41 = arith.constant 0 : index
    %62 = vector.load %arg14[%c0_40, %c0_41] : memref<1x128xf32, #tpu.memory_space<vmem>>, vector<1x128xf32>
    %63 = vector.broadcast %62 : vector<1x128xf32> to vector<8x128xf32>
    %64 = arith.addf %61, %63 : vector<8x128xf32>
    %cst_42 = arith.constant 0.000000e+00 : f32
    %65 = vector.broadcast %cst_42 : f32 to vector<8x128xf32>
    %66 = arith.maximumf %64, %65 : vector<8x128xf32>
    %67 = arith.truncf %66 : vector<8x128xf32> to vector<8x128xbf16>
    %c0_43 = arith.constant 0 : index
    %c0_44 = arith.constant 0 : index
    %68 = vector.load %arg15[%c0_43, %c0_44] : memref<128x128xbf16, #tpu.memory_space<vmem>>, vector<128x128xbf16>
    %cst_45 = arith.constant dense<0.000000e+00> : vector<8x128xf32>
    %69 = tpu.matmul %67, %68, %cst_45 {dimension_numbers = #tpu.dot_dimension_numbers<[1], [0], [0], [1], [0, 0, 1, 1], [], []>} : vector<8x128xbf16>, vector<128x128xbf16>, vector<8x128xf32> -> vector<8x128xf32>
    %c0_46 = arith.constant 0 : index
    %c0_47 = arith.constant 0 : index
    %70 = vector.load %arg16[%c0_46, %c0_47] : memref<1x128xf32, #tpu.memory_space<vmem>>, vector<1x128xf32>
    %71 = vector.broadcast %70 : vector<1x128xf32> to vector<8x128xf32>
    %72 = arith.addf %69, %71 : vector<8x128xf32>
    %cst_48 = arith.constant 0.000000e+00 : f32
    %73 = vector.broadcast %cst_48 : f32 to vector<8x128xf32>
    %74 = arith.maximumf %72, %73 : vector<8x128xf32>
    %75 = arith.truncf %74 : vector<8x128xf32> to vector<8x128xbf16>
    %c0_49 = arith.constant 0 : index
    %c0_50 = arith.constant 0 : index
    %76 = vector.load %arg17[%c0_49, %c0_50] : memref<128x128xbf16, #tpu.memory_space<vmem>>, vector<128x128xbf16>
    %cst_51 = arith.constant dense<0.000000e+00> : vector<8x128xf32>
    %77 = tpu.matmul %75, %76, %cst_51 {dimension_numbers = #tpu.dot_dimension_numbers<[1], [0], [0], [1], [0, 0, 1, 1], [], []>} : vector<8x128xbf16>, vector<128x128xbf16>, vector<8x128xf32> -> vector<8x128xf32>
    %c0_52 = arith.constant 0 : index
    %c0_53 = arith.constant 0 : index
    %78 = vector.load %arg18[%c0_52, %c0_53] : memref<1x128xf32, #tpu.memory_space<vmem>>, vector<1x128xf32>
    %79 = vector.broadcast %78 : vector<1x128xf32> to vector<8x128xf32>
    %80 = arith.addf %77, %79 : vector<8x128xf32>
    %c0_54 = arith.constant 0 : index
    %c0_55 = arith.constant 0 : index
    %81 = vector.load %arg19[%c0_54, %c0_55] : memref<8x128xf32, #tpu.memory_space<vmem>>, vector<8x128xf32>
    tpu.vector_store %arg19[%c0_54, %c0_55], %80 {strides = array<i32>} : memref<8x128xf32, #tpu.memory_space<vmem>>, vector<8x128xf32>,
    return
  }
  func.func @transform_0(%arg0: i32) -> (i32, i32) {
    %c0_i32 = arith.constant 0 : i32
    %c0_i32_0 = arith.constant 0 : i32
    return %arg0, %c0_i32 : i32, i32
  }
  func.func @transform_1(%arg0: i32) -> (i32, i32) {
    %c0_i32 = arith.constant 0 : i32
    %c0_i32_0 = arith.constant 0 : i32
    return %arg0, %c0_i32 : i32, i32
  }
  func.func @transform_2(%arg0: i32) -> (i32, i32) {
    %c0_i32 = arith.constant 0 : i32
    %c0_i32_0 = arith.constant 0 : i32
    %c0_i32_1 = arith.constant 0 : i32
    return %c0_i32, %c0_i32_0 : i32, i32
  }
  func.func @transform_3(%arg0: i32) -> (i32, i32) {
    %c0_i32 = arith.constant 0 : i32
    %c0_i32_0 = arith.constant 0 : i32
    %c0_i32_1 = arith.constant 0 : i32
    return %c0_i32, %c0_i32_0 : i32, i32
  }
  func.func @transform_4(%arg0: i32) -> (i32, i32) {
    %c0_i32 = arith.constant 0 : i32
    %c0_i32_0 = arith.constant 0 : i32
    %c0_i32_1 = arith.constant 0 : i32
    return %c0_i32, %c0_i32_0 : i32, i32
  }
  func.func @transform_5(%arg0: i32) -> (i32, i32) {
    %c0_i32 = arith.constant 0 : i32
    %c0_i32_0 = arith.constant 0 : i32
    %c0_i32_1 = arith.constant 0 : i32
    return %c0_i32, %c0_i32_0 : i32, i32
  }
  func.func @transform_6(%arg0: i32) -> (i32, i32) {
    %c0_i32 = arith.constant 0 : i32
    %c0_i32_0 = arith.constant 0 : i32
    %c0_i32_1 = arith.constant 0 : i32
    return %c0_i32, %c0_i32_0 : i32, i32
  }
  func.func @transform_7(%arg0: i32) -> (i32, i32) {
    %c0_i32 = arith.constant 0 : i32
    %c0_i32_0 = arith.constant 0 : i32
    %c0_i32_1 = arith.constant 0 : i32
    return %c0_i32, %c0_i32_0 : i32, i32
  }
  func.func @transform_8(%arg0: i32) -> (i32, i32) {
    %c0_i32 = arith.constant 0 : i32
    %c0_i32_0 = arith.constant 0 : i32
    %c0_i32_1 = arith.constant 0 : i32
    return %c0_i32, %c0_i32_0 : i32, i32
  }
  func.func @transform_9(%arg0: i32) -> (i32, i32) {
    %c0_i32 = arith.constant 0 : i32
    %c0_i32_0 = arith.constant 0 : i32
    %c0_i32_1 = arith.constant 0 : i32
    return %c0_i32, %c0_i32_0 : i32, i32
  }
  func.func @transform_10(%arg0: i32) -> (i32, i32) {
    %c0_i32 = arith.constant 0 : i32
    %c0_i32_0 = arith.constant 0 : i32
    %c0_i32_1 = arith.constant 0 : i32
    return %c0_i32, %c0_i32_0 : i32, i32
  }
  func.func @transform_11(%arg0: i32) -> (i32, i32) {
    %c0_i32 = arith.constant 0 : i32
    %c0_i32_0 = arith.constant 0 : i32
    %c0_i32_1 = arith.constant 0 : i32
    return %c0_i32, %c0_i32_0 : i32, i32
  }
  func.func @transform_12(%arg0: i32) -> (i32, i32) {
    %c0_i32 = arith.constant 0 : i32
    %c0_i32_0 = arith.constant 0 : i32
    %c0_i32_1 = arith.constant 0 : i32
    return %c0_i32, %c0_i32_0 : i32, i32
  }
  func.func @transform_13(%arg0: i32) -> (i32, i32) {
    %c0_i32 = arith.constant 0 : i32
    %c0_i32_0 = arith.constant 0 : i32
    %c0_i32_1 = arith.constant 0 : i32
    return %c0_i32, %c0_i32_0 : i32, i32
  }
  func.func @transform_14(%arg0: i32) -> (i32, i32) {
    %c0_i32 = arith.constant 0 : i32
    %c0_i32_0 = arith.constant 0 : i32
    %c0_i32_1 = arith.constant 0 : i32
    return %c0_i32, %c0_i32_0 : i32, i32
  }
  func.func @transform_15(%arg0: i32) -> (i32, i32) {
    %c0_i32 = arith.constant 0 : i32
    %c0_i32_0 = arith.constant 0 : i32
    %c0_i32_1 = arith.constant 0 : i32
    return %c0_i32, %c0_i32_0 : i32, i32
  }
  func.func @transform_16(%arg0: i32) -> (i32, i32) {
    %c0_i32 = arith.constant 0 : i32
    %c0_i32_0 = arith.constant 0 : i32
    %c0_i32_1 = arith.constant 0 : i32
    return %c0_i32, %c0_i32_0 : i32, i32
  }
  func.func @transform_17(%arg0: i32) -> (i32, i32) {
    %c0_i32 = arith.constant 0 : i32
    %c0_i32_0 = arith.constant 0 : i32
    %c0_i32_1 = arith.constant 0 : i32
    return %c0_i32, %c0_i32_0 : i32, i32
  }
  func.func @transform_18(%arg0: i32) -> (i32, i32) {
    %c0_i32 = arith.constant 0 : i32
    %c0_i32_0 = arith.constant 0 : i32
    return %arg0, %c0_i32 : i32, i32
  }
  func.func @transform_19(%arg0: i32) -> (i32, i32) {
    %c0_i32 = arith.constant 0 : i32
    %c0_i32_0 = arith.constant 0 : i32
    return %arg0, %c0_i32 : i32, i32
  }
}

</mosaic_0001>

<bundles_post_ra>
// kernel: tpu_custom_call.1
= control target key start
LH: loop header
LB: loop body
LE: loop exit
PB: predicated region body
PF: predicated region fallthrough
CT: control target
= control target key end

     0   :  { %s2610_s0 = inlined_call_operand.hbm [shape: bf16[8,128], index: 0, kind: input, shape index: {}]   ;;  %s2611_s1 = inlined_call_operand.hbm [shape: f32[8,128], index: 1, kind: input, shape index: {}]   ;;  %s2612_s2 = inlined_call_operand.hbm [shape: bf16[128,128], index: 2, kind: input, shape index: {}]   ;;  %s2613_s3 = inlined_call_operand.hbm [shape: f32[1,128], index: 3, kind: input, shape index: {}]   ;;  %s2614_s4 = inlined_call_operand.hbm [shape: bf16[128,128], index: 4, kind: input, shape index: {}]   ;;  %s2615_s5 = inlined_call_operand.hbm [shape: f32[1,128], index: 5, kind: input, shape index: {}]   ;;  %s2616_s6 = inlined_call_operand.hbm [shape: bf16[128,128], index: 6, kind: input, shape index: {}]   ;;  %s2617_s7 = inlined_call_operand.hbm [shape: f32[1,128], index: 7, kind: input, shape index: {}]   ;;  %s2618_s8 = inlined_call_operand.hbm [shape: bf16[128,256], index: 8, kind: input, shape index: {}]   ;;  %s2619_s9 = inlined_call_operand.hbm [shape: f32[1,256], index: 9, kind: input, shape index: {}]   ;;  %s2620_s10 = inlined_call_operand.hbm [shape: bf16[128,128], index: 10, kind: input, shape index: {}]   ;;  %s2621_s11 = inlined_call_operand.hbm [shape: f32[1,128], index: 11, kind: input, shape index: {}]   ;;  %s2622_s12 = inlined_call_operand.hbm [shape: bf16[128,128], index: 12, kind: input, shape index: {}]   ;;  %s2623_s13 = inlined_call_operand.hbm [shape: f32[1,128], index: 13, kind: input, shape index: {}]   ;;  %s2624_s14 = inlined_call_operand.hbm [shape: bf16[128,128], index: 14, kind: input, shape index: {}]   ;;  %s2625_s15 = inlined_call_operand.hbm [shape: f32[1,128], index: 15, kind: input, shape index: {}]   ;;  %s2626_s16 = inlined_call_operand.hbm [shape: bf16[128,128], index: 16, kind: input, shape index: {}]   ;;  %s2627_s17 = inlined_call_operand.hbm [shape: f32[1,128], index: 17, kind: input, shape index: {}]   ;;  %s2628_s18 = inlined_call_operand.hbm [shape: f32[8,128], index: 18, kind: output, shape index: {0}]   ;;  %s2629_s19 = inlined_call_operand.hbm [shape: f32[8,128], index: 19, kind: output, shape index: {1}]  }
   0x1   :  { %2634 = sst [smem:[#allocation46_spill]] %s2610_s0 }
   0x2   :  { %2635 = sst [smem:[#allocation47_spill]] %s2611_s1 }
   0x3   :  { %2636 = sst [smem:[#allocation48_spill]] %s2612_s2 }
   0x4   :  { %2637 = sst [smem:[#allocation49_spill]] %s2613_s3 }
   0x5   :  { %25 = vsyncpa [#allocation3], 0 }
   0x6   :  { %26 = vsyncpa [#allocation6], 0 }
   0x7   :  { %27 = vsyncpa [#allocation9], 0 }
   0x8   :  { %28 = vsyncpa [#allocation12], 0 }
   0x9   :  { %29 = vsyncpa [#allocation15], 0 }
   0xa   :  { %30 = vsyncpa [#allocation18], 0 }
   0xb   :  { %31 = vsyncpa [#allocation21], 0 }
   0xc   :  { %32 = vsyncpa [#allocation24], 0 }
   0xd   :  { %33 = vsyncpa [#allocation27], 0 }
   0xe   :  { %34 = vsyncpa [#allocation30], 0 }
   0xf   :  { %35 = vsyncpa [#allocation4], 0 }
  0x10   :  { %36 = vsyncpa [#allocation33], 0  ;;  %s2138_s0 = smov [#allocation5]   ;;  %s2139_s20 = smov [#allocation8]  }
  0x11   :  { %s53_s30 = sshll.u32 %s2138_s0, 4  ;;  %s75_s21 = sshll.u32 %s2139_s20, 4  ;;  %s54_s30 = int_to_ptr.vmem [resolvable:$true] %s53_s30  ;;  %s76_s21 = int_to_ptr.vmem [resolvable:$true] %s75_s21 }
  0x12   :  { %s2638_s2 = sld [smem:[#allocation47_spill]] }
  0x18   :  { %s1674_s23 = scalar_lea.hbm %s2638_s2, 128 }
  0x19   :  { %p1675_p0 = scmp.ne.s32.totalorder %s2638_s2, %s1674_s23  ;;  %p1678_p1 = scmp.lt.u32.totalorder %s1674_s23, %s2638_s2 }
  0x1b   :  { %p1680_p2 = pnand %p1678_p1, %p1675_p0 }
  0x1d   :  { %1683 = shalt.err (!%p1680_p2)
}
  0x1e   :  { %s1684_s27 = scalar_lea.vmem %s54_s30, 128  ;;  %p1689_p4 = scmp.lt.s32.totalorder %s54_s30, %s54_s30 }
  0x1f   :  { %p1685_p3 = scmp.ne.s32.totalorder %s54_s30, %s1684_s27  ;;  %p1690_p5 = scmp.lt.s32.totalorder %s1684_s27, %s1684_s27 }
  0x21   :  { %p1691_p6 = por %p1690_p5, %p1689_p4 }
  0x23   :  { %p1692_p7 = pnand %p1691_p6, %p1685_p3 }
  0x25   :  { %1695 = shalt.err (!%p1692_p7)
}
  0x26   :  { %56 = dma.hbm_to_vmem [thread:$0]  %s2638_s2, 128, %s54_s30, [#allocation6]  }
  0x27   :  { %s2639_s1 = sld [smem:[#allocation49_spill]] }
  0x2d   :  { %s1696_s22 = scalar_lea.hbm %s2639_s1, 16 }
  0x2e   :  { %p1697_p8 = scmp.ne.s32.totalorder %s2639_s1, %s1696_s22  ;;  %p1700_p9 = scmp.lt.u32.totalorder %s1696_s22, %s2639_s1 }
  0x30   :  { %p1702_p10 = pnand %p1700_p9, %p1697_p8 }
  0x32   :  { %1705 = shalt.err (!%p1702_p10)
}
  0x33   :  { %s1706_s26 = scalar_lea.vmem %s76_s21, 16  ;;  %s1710_s27 = scalar_lea.vmem %s76_s21, 32 }
  0x34   :  { %p1707_p11 = scmp.ne.s32.totalorder %s76_s21, %s1706_s26  ;;  %p1711_p12 = scmp.lt.s32.totalorder %s76_s21, %s76_s21 }
  0x35   :  { %p1712_p13 = scmp.lt.s32.totalorder %s1710_s27, %s1706_s26 }
  0x37   :  { %p1713_p0 = por %p1712_p13, %p1711_p12 }
  0x39   :  { %p1714_p1 = pnand %p1713_p0, %p1707_p11 }
  0x3b   :  { %1717 = shalt.err (!%p1714_p1)
}
  0x3c   :  { %78 = dma.hbm_to_vmem [thread:$0]  %s2639_s1, 16, %s76_s21, [#allocation9]  }
  0x3d   :  { %s2140_s28 = smov [#allocation11]   ;;  %s2141_s0 = smov [#allocation14]  }
  0x3e   :  { %s97_s29 = sshll.u32 %s2140_s28, 4  ;;  %s119_s20 = sshll.u32 %s2141_s0, 4  ;;  %s98_s29 = int_to_ptr.vmem [resolvable:$true] %s97_s29  ;;  %s120_s20 = int_to_ptr.vmem [resolvable:$true] %s119_s20 }
  0x3f   :  { %s1718_s25 = scalar_lea.hbm %s2615_s5, 16 }
  0x40   :  { %p1719_p2 = scmp.ne.s32.totalorder %s2615_s5, %s1718_s25  ;;  %p1722_p3 = scmp.lt.u32.totalorder %s1718_s25, %s2615_s5 }
  0x42   :  { %p1724_p4 = pnand %p1722_p3, %p1719_p2 }
  0x44   :  { %1727 = shalt.err (!%p1724_p4)
}
  0x45   :  { %s1728_s21 = scalar_lea.vmem %s98_s29, 16  ;;  %s1732_s1 = scalar_lea.vmem %s98_s29, 32 }
  0x46   :  { %p1729_p5 = scmp.ne.s32.totalorder %s98_s29, %s1728_s21  ;;  %p1733_p6 = scmp.lt.s32.totalorder %s98_s29, %s98_s29 }
  0x47   :  { %p1734_p7 = scmp.lt.s32.totalorder %s1732_s1, %s1728_s21 }
  0x49   :  { %p1735_p8 = por %p1734_p7, %p1733_p6 }
  0x4b   :  { %p1736_p9 = pnand %p1735_p8, %p1729_p5 }
  0x4d   :  { %1739 = shalt.err (!%p1736_p9)
}
  0x4e   :  { %100 = dma.hbm_to_vmem [thread:$0]  %s2615_s5, 16, %s98_s29, [#allocation12]  }
  0x4f   :  { %s1740_s22 = scalar_lea.hbm %s2617_s7, 16 }
  0x50   :  { %p1741_p10 = scmp.ne.s32.totalorder %s2617_s7, %s1740_s22  ;;  %p1744_p11 = scmp.lt.u32.totalorder %s1740_s22, %s2617_s7 }
  0x52   :  { %p1746_p12 = pnand %p1744_p11, %p1741_p10 }
  0x54   :  { %1749 = shalt.err (!%p1746_p12)
}
  0x55   :  { %s1750_s26 = scalar_lea.vmem %s120_s20, 16  ;;  %s1754_s27 = scalar_lea.vmem %s120_s20, 32 }
  0x56   :  { %p1751_p13 = scmp.ne.s32.totalorder %s120_s20, %s1750_s26  ;;  %p1755_p0 = scmp.lt.s32.totalorder %s120_s20, %s120_s20 }
  0x57   :  { %p1756_p1 = scmp.lt.s32.totalorder %s1754_s27, %s1750_s26 }
  0x59   :  { %p1757_p2 = por %p1756_p1, %p1755_p0 }
  0x5b   :  { %p1758_p3 = pnand %p1757_p2, %p1751_p13 }
  0x5d   :  { %1761 = shalt.err (!%p1758_p3)
}
  0x5e   :  { %122 = dma.hbm_to_vmem [thread:$0]  %s2617_s7, 16, %s120_s20, [#allocation15]  }
  0x5f   :  { %s2142_s21 = smov [#allocation17]   ;;  %s2143_s30 = smov [#allocation20]  }
  0x60   :  { %s141_s1 = sshll.u32 %s2142_s21, 4  ;;  %s163_s2 = sshll.u32 %s2143_s30, 4  ;;  %s142_s1 = int_to_ptr.vmem [resolvable:$true] %s141_s1  ;;  %s164_s2 = int_to_ptr.vmem [resolvable:$true] %s163_s2 }
  0x61   :  { %s1762_s22 = scalar_lea.hbm %s2619_s9, 32 }
  0x62   :  { %p1763_p4 = scmp.ne.s32.totalorder %s2619_s9, %s1762_s22  ;;  %p1766_p5 = scmp.lt.u32.totalorder %s1762_s22, %s2619_s9 }
  0x64   :  { %p1768_p6 = pnand %p1766_p5, %p1763_p4 }
  0x66   :  { %1771 = shalt.err (!%p1768_p6)
}
  0x67   :  { %s1772_s7 = scalar_lea.vmem %s142_s1, 32  ;;  %p1777_p8 = scmp.lt.s32.totalorder %s142_s1, %s142_s1 }
  0x68   :  { %p1773_p7 = scmp.ne.s32.totalorder %s142_s1, %s1772_s7  ;;  %p1778_p9 = scmp.lt.s32.totalorder %s1772_s7, %s1772_s7 }
  0x6a   :  { %p1779_p10 = por %p1778_p9, %p1777_p8 }
  0x6c   :  { %p1780_p11 = pnand %p1779_p10, %p1773_p7 }
  0x6e   :  { %1783 = shalt.err (!%p1780_p11)
}
  0x6f   :  { %144 = dma.hbm_to_vmem [thread:$0]  %s2619_s9, 32, %s142_s1, [#allocation18]  }
  0x70   :  { %s1784_s29 = scalar_lea.hbm %s2621_s11, 16 }
  0x71   :  { %p1785_p12 = scmp.ne.s32.totalorder %s2621_s11, %s1784_s29  ;;  %p1788_p13 = scmp.lt.u32.totalorder %s1784_s29, %s2621_s11 }
  0x73   :  { %p1790_p0 = pnand %p1788_p13, %p1785_p12 }
  0x75   :  { %1793 = shalt.err (!%p1790_p0)
}
  0x76   :  { %s1794_s22 = scalar_lea.vmem %s164_s2, 16  ;;  %s1798_s24 = scalar_lea.vmem %s164_s2, 32 }
  0x77   :  { %p1795_p1 = scmp.ne.s32.totalorder %s164_s2, %s1794_s22  ;;  %p1799_p2 = scmp.lt.s32.totalorder %s164_s2, %s164_s2 }
  0x78   :  { %p1800_p3 = scmp.lt.s32.totalorder %s1798_s24, %s1794_s22 }
  0x7a   :  { %p1801_p4 = por %p1800_p3, %p1799_p2 }
  0x7c   :  { %p1802_p5 = pnand %p1801_p4, %p1795_p1 }
  0x7e   :  { %1805 = shalt.err (!%p1802_p5)
}
  0x7f   :  { %166 = dma.hbm_to_vmem [thread:$0]  %s2621_s11, 16, %s164_s2, [#allocation21]  }
  0x80   :  { %s2144_s25 = smov [#allocation23]   ;;  %s2145_s3 = smov [#allocation26]  }
  0x81   :  { %s185_s23 = sshll.u32 %s2144_s25, 4  ;;  %s207_s7 = sshll.u32 %s2145_s3, 4  ;;  %s186_s23 = int_to_ptr.vmem [resolvable:$true] %s185_s23  ;;  %s208_s7 = int_to_ptr.vmem [resolvable:$true] %s207_s7 }
  0x82   :  { %s1806_s27 = scalar_lea.hbm %s2623_s13, 16 }
  0x83   :  { %p1807_p6 = scmp.ne.s32.totalorder %s2623_s13, %s1806_s27  ;;  %p1810_p7 = scmp.lt.u32.totalorder %s1806_s27, %s2623_s13 }
  0x85   :  { %p1812_p8 = pnand %p1810_p7, %p1807_p6 }
  0x87   :  { %1815 = shalt.err (!%p1812_p8)
}
  0x88   :  { %s1816_s11 = scalar_lea.vmem %s186_s23, 16  ;;  %s1820_s2 = scalar_lea.vmem %s186_s23, 32 }
  0x89   :  { %p1817_p9 = scmp.ne.s32.totalorder %s186_s23, %s1816_s11  ;;  %p1821_p10 = scmp.lt.s32.totalorder %s186_s23, %s186_s23 }
  0x8a   :  { %p1822_p11 = scmp.lt.s32.totalorder %s1820_s2, %s1816_s11 }
  0x8c   :  { %p1823_p12 = por %p1822_p11, %p1821_p10 }
  0x8e   :  { %p1824_p13 = pnand %p1823_p12, %p1817_p9 }
  0x90   :  { %1827 = shalt.err (!%p1824_p13)
}
  0x91   :  { %188 = dma.hbm_to_vmem [thread:$0]  %s2623_s13, 16, %s186_s23, [#allocation24]  }
  0x92   :  { %s1828_s9 = scalar_lea.hbm %s2625_s15, 16 }
  0x93   :  { %p1829_p0 = scmp.ne.s32.totalorder %s2625_s15, %s1828_s9  ;;  %p1832_p1 = scmp.lt.u32.totalorder %s1828_s9, %s2625_s15 }
  0x95   :  { %p1834_p2 = pnand %p1832_p1, %p1829_p0 }
  0x97   :  { %1837 = shalt.err (!%p1834_p2)
}
  0x98   :  { %s1838_s26 = scalar_lea.vmem %s208_s7, 16  ;;  %s1842_s27 = scalar_lea.vmem %s208_s7, 32 }
  0x99   :  { %p1839_p3 = scmp.ne.s32.totalorder %s208_s7, %s1838_s26  ;;  %p1843_p4 = scmp.lt.s32.totalorder %s208_s7, %s208_s7 }
  0x9a   :  { %p1844_p5 = scmp.lt.s32.totalorder %s1842_s27, %s1838_s26 }
  0x9c   :  { %p1845_p6 = por %p1844_p5, %p1843_p4 }
  0x9e   :  { %p1846_p7 = pnand %p1845_p6, %p1839_p3 }
  0xa0   :  { %1849 = shalt.err (!%p1846_p7)
}
  0xa1   :  { %210 = dma.hbm_to_vmem [thread:$0]  %s2625_s15, 16, %s208_s7, [#allocation27]  }
  0xa2   :  { %s2146_s5 = smov [#allocation2]   ;;  %s2147_s21 = smov [#allocation7]  }
  0xa3   :  { %s43_s29 = sshll.u32 %s2146_s5, 4  ;;  %s62_s30 = sshll.u32 %s2147_s21, 4  ;;  %s44_s29 = int_to_ptr.vmem [resolvable:$true] %s43_s29  ;;  %s2361_s30 = int_to_ptr.vmem [resolvable:$true] %s62_s30 }
  0xa4   :  { %s2640_s28 = sld [smem:[#allocation46_spill]] }
  0xaa   :  { %s1850_s0 = scalar_lea.hbm %s2640_s28, 64 }
  0xab   :  { %p1851_p8 = scmp.ne.s32.totalorder %s2640_s28, %s1850_s0  ;;  %p1854_p9 = scmp.lt.u32.totalorder %s1850_s0, %s2640_s28 }
  0xad   :  { %p1856_p10 = pnand %p1854_p9, %p1851_p8 }
  0xaf   :  { %1859 = shalt.err (!%p1856_p10)
}
  0xb0   :  { %s1860_s15 = scalar_lea.vmem %s44_s29, 64  ;;  %p1865_p12 = scmp.lt.s32.totalorder %s44_s29, %s44_s29 }
  0xb1   :  { %p1861_p11 = scmp.ne.s32.totalorder %s44_s29, %s1860_s15  ;;  %p1866_p13 = scmp.lt.s32.totalorder %s1860_s15, %s1860_s15 }
  0xb3   :  { %p1867_p0 = por %p1866_p13, %p1865_p12 }
  0xb5   :  { %p1868_p1 = pnand %p1867_p0, %p1861_p11 }
  0xb7   :  { %1871 = shalt.err (!%p1868_p1)
}
  0xb8   :  { %46 = dma.hbm_to_vmem [thread:$0]  %s2640_s28, 64, %s44_s29, [#allocation3]  }
  0xb9   :  { %s2641_s26 = sld [smem:[#allocation48_spill]] }
  0xbf   :  { %s1872_s27 = scalar_lea.hbm %s2641_s26, 1024 }
  0xc0   :  { %p1873_p2 = scmp.ne.s32.totalorder %s2641_s26, %s1872_s27  ;;  %p1876_p3 = scmp.lt.u32.totalorder %s1872_s27, %s2641_s26 }
  0xc2   :  { %p1878_p4 = pnand %p1876_p3, %p1873_p2 }
  0xc4   :  { %1881 = shalt.err (!%p1878_p4)
}
  0xc5   :  { %s1882_s11 = scalar_lea.vmem %s2361_s30, 1024  ;;  %p1887_p6 = scmp.lt.s32.totalorder %s2361_s30, %s2361_s30 }
  0xc6   :  { %p1883_p5 = scmp.ne.s32.totalorder %s2361_s30, %s1882_s11  ;;  %p1888_p7 = scmp.lt.s32.totalorder %s1882_s11, %s1882_s11 }
  0xc8   :  { %p1889_p8 = por %p1888_p7, %p1887_p6 }
  0xca   :  { %p1890_p9 = pnand %p1889_p8, %p1883_p5 }
  0xcc   :  { %1893 = shalt.err (!%p1890_p9)
}
  0xcd   :  { %s2148_s29 = smov 64   ;;  %s2149_s2 = smov 4  }
  0xce   :  { %68 = dma.hbm_to_vmem [thread:$0]  %s2641_s26, 1024, %s2361_s30, [#allocation6], %s2148_s29, %s2148_s29, %s2149_s2  }
  0xcf   :  { %s2150_s22 = smov [#allocation10]   ;;  %s2151_s9 = smov [#allocation13]  }
  0xd0   :  { %s84_s24 = sshll.u32 %s2150_s22, 4  ;;  %s106_s1 = sshll.u32 %s2151_s9, 4  ;;  %s85_s24 = int_to_ptr.vmem [resolvable:$true] %s84_s24  ;;  %s2395_s1 = int_to_ptr.vmem [resolvable:$true] %s106_s1 }
  0xd1   :  { %s1894_s25 = scalar_lea.hbm %s2614_s4, 1024 }
  0xd2   :  { %p1895_p10 = scmp.ne.s32.totalorder %s2614_s4, %s1894_s25  ;;  %p1898_p11 = scmp.lt.u32.totalorder %s1894_s25, %s2614_s4 }
  0xd4   :  { %p1900_p12 = pnand %p1898_p11, %p1895_p10 }
  0xd6   :  { %1903 = shalt.err (!%p1900_p12)
}
  0xd7   :  { %s1904_s30 = scalar_lea.vmem %s85_s24, 1024  ;;  %p1909_p0 = scmp.lt.s32.totalorder %s85_s24, %s85_s24 }
  0xd8   :  { %p1905_p13 = scmp.ne.s32.totalorder %s85_s24, %s1904_s30  ;;  %p1910_p1 = scmp.lt.s32.totalorder %s1904_s30, %s1904_s30 }
  0xda   :  { %p1911_p2 = por %p1910_p1, %p1909_p0 }
  0xdc   :  { %p1912_p3 = pnand %p1911_p2, %p1905_p13 }
  0xde   :  { %1915 = shalt.err (!%p1912_p3)
}
  0xdf   :  { %90 = dma.hbm_to_vmem [thread:$0]  %s2614_s4, 1024, %s85_s24, [#allocation9], %s2148_s29, %s2148_s29, %s2149_s2  }
  0xe0   :  { %s1916_s11 = scalar_lea.hbm %s2616_s6, 1024 }
  0xe1   :  { %p1917_p4 = scmp.ne.s32.totalorder %s2616_s6, %s1916_s11  ;;  %p1920_p5 = scmp.lt.u32.totalorder %s1916_s11, %s2616_s6 }
  0xe3   :  { %p1922_p6 = pnand %p1920_p5, %p1917_p4 }
  0xe5   :  { %1925 = shalt.err (!%p1922_p6)
}
  0xe6   :  { %s1926_s15 = scalar_lea.vmem %s2395_s1, 1024  ;;  %p1931_p8 = scmp.lt.s32.totalorder %s2395_s1, %s2395_s1 }
  0xe7   :  { %p1927_p7 = scmp.ne.s32.totalorder %s2395_s1, %s1926_s15  ;;  %p1932_p9 = scmp.lt.s32.totalorder %s1926_s15, %s1926_s15 }
  0xe9   :  { %p1933_p10 = por %p1932_p9, %p1931_p8 }
  0xeb   :  { %p1934_p11 = pnand %p1933_p10, %p1927_p7 }
  0xed   :  { %1937 = shalt.err (!%p1934_p11)
}
  0xee   :  { %112 = dma.hbm_to_vmem [thread:$0]  %s2616_s6, 1024, %s2395_s1, [#allocation12], %s2148_s29, %s2148_s29, %s2149_s2  }
  0xef   :  { %s2152_s7 = smov [#allocation16]   ;;  %s1938_s27 = scalar_lea.hbm %s2618_s8, 2048 }
  0xf0   :  { %s128_s25 = sshll.u32 %s2152_s7, 4  ;;  %p1939_p12 = scmp.ne.s32.totalorder %s2618_s8, %s1938_s27  ;;  %s129_s25 = int_to_ptr.vmem [resolvable:$true] %s128_s25 }
  0xf1   :  { %p1942_p13 = scmp.lt.u32.totalorder %s1938_s27, %s2618_s8 }
  0xf3   :  { %p1944_p0 = pnand %p1942_p13, %p1939_p12 }
  0xf5   :  { %1947 = shalt.err (!%p1944_p0)
}
  0xf6   :  { %s1948_s5 = scalar_lea.vmem %s129_s25, 2048  ;;  %p1953_p2 = scmp.lt.s32.totalorder %s129_s25, %s129_s25 }
  0xf7   :  { %p1949_p1 = scmp.ne.s32.totalorder %s129_s25, %s1948_s5  ;;  %p1954_p3 = scmp.lt.s32.totalorder %s1948_s5, %s1948_s5 }
  0xf9   :  { %p1955_p4 = por %p1954_p3, %p1953_p2 }
  0xfb   :  { %p1956_p5 = pnand %p1955_p4, %p1949_p1 }
  0xfd   :  { %1959 = shalt.err (!%p1956_p5)
}
  0xfe   :  { %s2153_s6 = smov 128   ;;  %s2154_s1 = smov 8  }
  0xff   :  { %134 = dma.hbm_to_vmem [thread:$0]  %s2618_s8, 2048, %s129_s25, [#allocation15], %s2153_s6, %s2153_s6, %s2154_s1  }
 0x100   :  { %s2155_s28 = smov [#allocation19]   ;;  %s2156_s22 = smov [#allocation22]  }
 0x101   :  { %s150_s0 = sshll.u32 %s2155_s28, 4  ;;  %s172_s9 = sshll.u32 %s2156_s22, 4  ;;  %s151_s0 = int_to_ptr.vmem [resolvable:$true] %s150_s0  ;;  %s173_s9 = int_to_ptr.vmem [resolvable:$true] %s172_s9 }
 0x102   :  { %s1960_s24 = scalar_lea.hbm %s2620_s10, 1024 }
 0x103   :  { %p1961_p6 = scmp.ne.s32.totalorder %s2620_s10, %s1960_s24  ;;  %p1964_p7 = scmp.lt.u32.totalorder %s1960_s24, %s2620_s10 }
 0x105   :  { %p1966_p8 = pnand %p1964_p7, %p1961_p6 }
 0x107   :  { %1969 = shalt.err (!%p1966_p8)
}
 0x108   :  { %s1970_s8 = scalar_lea.vmem %s151_s0, 1024  ;;  %p1975_p10 = scmp.lt.s32.totalorder %s151_s0, %s151_s0 }
 0x109   :  { %p1971_p9 = scmp.ne.s32.totalorder %s151_s0, %s1970_s8  ;;  %p1976_p11 = scmp.lt.s32.totalorder %s1970_s8, %s1970_s8 }
 0x10b   :  { %p1977_p12 = por %p1976_p11, %p1975_p10 }
 0x10d   :  { %p1978_p13 = pnand %p1977_p12, %p1971_p9 }
 0x10f   :  { %1981 = shalt.err (!%p1978_p13)
}
 0x110   :  { %156 = dma.hbm_to_vmem [thread:$0]  %s2620_s10, 1024, %s151_s0, [#allocation18], %s2148_s29, %s2148_s29, %s2149_s2  }
 0x111   :  { %s1982_s23 = scalar_lea.hbm %s2622_s12, 1024 }
 0x112   :  { %p1983_p0 = scmp.ne.s32.totalorder %s2622_s12, %s1982_s23  ;;  %p1986_p1 = scmp.lt.u32.totalorder %s1982_s23, %s2622_s12 }
 0x114   :  { %p1988_p2 = pnand %p1986_p1, %p1983_p0 }
 0x116   :  { %1991 = shalt.err (!%p1988_p2)
}
 0x117   :  { %s1992_s11 = scalar_lea.vmem %s173_s9, 1024  ;;  %p1997_p4 = scmp.lt.s32.totalorder %s173_s9, %s173_s9 }
 0x118   :  { %p1993_p3 = scmp.ne.s32.totalorder %s173_s9, %s1992_s11  ;;  %p1998_p5 = scmp.lt.s32.totalorder %s1992_s11, %s1992_s11 }
 0x11a   :  { %p1999_p6 = por %p1998_p5, %p1997_p4 }
 0x11c   :  { %p2000_p7 = pnand %p1999_p6, %p1993_p3 }
 0x11e   :  { %2003 = shalt.err (!%p2000_p7)
}
 0x11f   :  { %178 = dma.hbm_to_vmem [thread:$0]  %s2622_s12, 1024, %s173_s9, [#allocation21], %s2148_s29, %s2148_s29, %s2149_s2  }
 0x120   :  { %s2157_s0 = smov [#allocation25]   ;;  %s2158_s15 = smov [#allocation28]  }
 0x121   :  { %s194_s22 = sshll.u32 %s2157_s0, 4  ;;  %s216_s4 = sshll.u32 %s2158_s15, 4  ;;  %s195_s22 = int_to_ptr.vmem [resolvable:$true] %s194_s22  ;;  %s217_s4 = int_to_ptr.vmem [resolvable:$true] %s216_s4 }
 0x122   :  { %s2004_s3 = scalar_lea.hbm %s2624_s14, 1024 }
 0x123   :  { %p2005_p8 = scmp.ne.s32.totalorder %s2624_s14, %s2004_s3  ;;  %p2008_p9 = scmp.lt.u32.totalorder %s2004_s3, %s2624_s14 }
 0x125   :  { %p2010_p10 = pnand %p2008_p9, %p2005_p8 }
 0x127   :  { %2013 = shalt.err (!%p2010_p10)
}
 0x128   :  { %s2014_s12 = scalar_lea.vmem %s195_s22, 1024  ;;  %p2019_p12 = scmp.lt.s32.totalorder %s195_s22, %s195_s22 }
 0x129   :  { %p2015_p11 = scmp.ne.s32.totalorder %s195_s22, %s2014_s12  ;;  %p2020_p13 = scmp.lt.s32.totalorder %s2014_s12, %s2014_s12 }
 0x12b   :  { %p2021_p0 = por %p2020_p13, %p2019_p12 }
 0x12d   :  { %p2022_p1 = pnand %p2021_p0, %p2015_p11 }
 0x12f   :  { %2025 = shalt.err (!%p2022_p1)
}
 0x130   :  { %200 = dma.hbm_to_vmem [thread:$0]  %s2624_s14, 1024, %s195_s22, [#allocation24], %s2148_s29, %s2148_s29, %s2149_s2  }
 0x131   :  { %s2026_s23 = scalar_lea.hbm %s2626_s16, 1024 }
 0x132   :  { %p2027_p2 = scmp.ne.s32.totalorder %s2626_s16, %s2026_s23  ;;  %p2030_p3 = scmp.lt.u32.totalorder %s2026_s23, %s2626_s16 }
 0x134   :  { %p2032_p4 = pnand %p2030_p3, %p2027_p2 }
 0x136   :  { %2035 = shalt.err (!%p2032_p4)
}
 0x137   :  { %s2036_s11 = scalar_lea.vmem %s217_s4, 1024  ;;  %p2041_p6 = scmp.lt.s32.totalorder %s217_s4, %s217_s4 }
 0x138   :  { %p2037_p5 = scmp.ne.s32.totalorder %s217_s4, %s2036_s11  ;;  %p2042_p7 = scmp.lt.s32.totalorder %s2036_s11, %s2036_s11 }
 0x13a   :  { %p2043_p8 = por %p2042_p7, %p2041_p6 }
 0x13c   :  { %p2044_p9 = pnand %p2043_p8, %p2037_p5 }
 0x13e   :  { %2047 = shalt.err (!%p2044_p9)
}
 0x13f   :  { %222 = dma.hbm_to_vmem [thread:$0]  %s2626_s16, 1024, %s217_s4, [#allocation27], %s2148_s29, %s2148_s29, %s2149_s2  }
 0x140   :  { %s2159_s28 = smov [#allocation29]   ;;  %s2048_s24 = scalar_lea.hbm %s2627_s17, 16 }
 0x141   :  { %s229_s0 = sshll.u32 %s2159_s28, 4  ;;  %p2049_p10 = scmp.ne.s32.totalorder %s2627_s17, %s2048_s24  ;;  %s230_s0 = int_to_ptr.vmem [resolvable:$true] %s229_s0 }
 0x142   :  { %p2052_p11 = scmp.lt.u32.totalorder %s2048_s24, %s2627_s17 }
 0x144   :  { %p2054_p12 = pnand %p2052_p11, %p2049_p10 }
 0x146   :  { %2057 = shalt.err (!%p2054_p12)
}
 0x147   :  { %s2058_s8 = scalar_lea.vmem %s230_s0, 16  ;;  %s2062_s16 = scalar_lea.vmem %s230_s0, 32 }
 0x148   :  { %p2059_p13 = scmp.ne.s32.totalorder %s230_s0, %s2058_s8  ;;  %p2063_p0 = scmp.lt.s32.totalorder %s230_s0, %s230_s0 }
 0x149   :  { %p2064_p1 = scmp.lt.s32.totalorder %s2062_s16, %s2058_s8 }
 0x14b   :  { %p2065_p2 = por %p2064_p1, %p2063_p0 }
 0x14d   :  { %p2066_p3 = pnand %p2065_p2, %p2059_p13 }
 0x14f   :  { %2069 = shalt.err (!%p2066_p3)
}
 0x150   :  { %232 = dma.hbm_to_vmem [thread:$0]  %s2627_s17, 16, %s230_s0, [#allocation30]  }
 0x151   :  { %2114 = dma.done.wait [#allocation3], 64  }
 0x152   :  { %2115 = vsyncadd [#allocation3], 4294967232 }
 0x153   :  { %2116 = dma.done.wait [#allocation6], 1152  }
 0x154   :  { %2117 = vsyncadd [#allocation6], 4294966144 }
 0x155   :  { %2118 = dma.done.wait [#allocation9], 1040  }
 0x156   :  { %2119 = vsyncadd [#allocation9], 4294966256 }
 0x157   :  { %2120 = dma.done.wait [#allocation12], 1040  }
 0x158   :  { %2121 = vsyncadd [#allocation12], 4294966256 }
 0x159   :  { %2122 = dma.done.wait [#allocation15], 2064  }
 0x15a   :  { %2123 = vsyncadd [#allocation15], 4294965232 }
 0x15b   :  { %2124 = dma.done.wait [#allocation18], 1056  }
 0x15c   :  { %2125 = vsyncadd [#allocation18], 4294966240 }
 0x15d   :  { %2126 = dma.done.wait [#allocation21], 1040  }
 0x15e   :  { %2127 = vsyncadd [#allocation21], 4294966256 }
 0x15f   :  { %2128 = dma.done.wait [#allocation24], 1040  }
 0x160   :  { %2129 = vsyncadd [#allocation24], 4294966256 }
 0x161   :  { %2130 = dma.done.wait [#allocation27], 1040  }
 0x162   :  { %2131 = vsyncadd [#allocation27], 4294966256 }
 0x163   :  { %2132 = dma.done.wait [#allocation30], 16  }
 0x164   :  { %2133 = vsyncadd [#allocation30], 4294967280  ;;  %v2160_v0 = vmov 0.0   ;;  %vm2161_vm0 = vmmov 0   ;;  %v1592_v1 = vld [vmem:[#allocation7] sm:$0xff]   ;;  %v1593_v2 = vld [vmem:[#allocation7 + $0x8] sm:$0xff]  }
 0x165   :  { %1425 = vmatprep.subr.bf16.mxu0 %v2160_v0  ;;  %1441 = vmatprep.mubr.msk.bf16.mxu0 %vm2161_vm0, %v2160_v0  ;;  %v1594_v3 = vld [vmem:[#allocation7 + $0x10] sm:$0xff]   ;;  %v1600_v4 = vld [vmem:[#allocation10] sm:$0xff]   ;;  %v1595_v5 = vld [vmem:[#allocation7 + $0x18] sm:$0xff]   ;;  %v2162_v58 = vmov 0   ;;  %s2163_s17 = smov [#allocation32]  }
 0x166   :  { %1445 = vmatprep.subr.bf16.mxu1 %v2160_v0  ;;  %1461 = vmatprep.mubr.msk.bf16.mxu1 %vm2161_vm0, %v2160_v0  ;;  %v1601_v6 = vld [vmem:[#allocation10 + $0x8] sm:$0xff]   ;;  %v1596_v7 = vld [vmem:[#allocation7 + $0x20] sm:$0xff]   ;;  %v1602_v8 = vld [vmem:[#allocation10 + $0x10] sm:$0xff]   ;;  %s1260_s4 = sshll.u32 %s2163_s17, 4  ;;  %s1261_s4 = int_to_ptr.vmem [resolvable:$true] %s1260_s4 }
 0x167   :  { %1426 = vmatpush3.bf16.msra.mxu0 %v1592_v1  ;;  %1446 = vmatpush3.bf16.msra.mxu1 %v1600_v4  ;;  %v1597_v9 = vld [vmem:[#allocation7 + $0x28] sm:$0xff]   ;;  %v1603_v10 = vld [vmem:[#allocation10 + $0x18] sm:$0xff]   ;;  %v1598_v11 = vld [vmem:[#allocation7 + $0x30] sm:$0xff]   ;;  %s2070_s25 = scalar_lea.vmem %s1261_s4, 128  ;;  %p2075_p5 = scmp.lt.s32.totalorder %s1261_s4, %s1261_s4 }
 0x168   :  { %1427 = vmatprep.subr.bf16.mxu0 %v2160_v0  ;;  %1447 = vmatprep.subr.bf16.mxu1 %v2160_v0  ;;  %v1604_v12 = vld [vmem:[#allocation10 + $0x20] sm:$0xff]   ;;  %v1599_v13 = vld [vmem:[#allocation7 + $0x38] sm:$0xff]   ;;  %v1605_v14 = vld [vmem:[#allocation10 + $0x28] sm:$0xff]   ;;  %p2071_p4 = scmp.ne.s32.totalorder %s1261_s4, %s2070_s25  ;;  %p2076_p6 = scmp.lt.s32.totalorder %s2070_s25, %s2070_s25 }
 0x169   :  { %v288_v15 = vld [vmem:[#allocation2] sm:$0xf]  ;;  %v1607_v17 = vld [vmem:[#allocation10 + $0x38] sm:$0xff]   ;;  %v1608_v18 = vld [vmem:[#allocation13] sm:$0xff]  }
 0x16a   :  { %v1606_v16 = vld [vmem:[#allocation10 + $0x30] sm:$0xff]   ;;  %v1611_v21 = vld [vmem:[#allocation13 + $0x18] sm:$0xff]   ;;  %v1612_v22 = vld [vmem:[#allocation13 + $0x20] sm:$0xff]   ;;  %p2077_p7 = por %p2076_p6, %p2075_p5 }
 0x16b   :  { %1428 = vmatpush3.bf16.msra.mxu0 %v1593_v2  ;;  %1448 = vmatpush3.bf16.msra.mxu1 %v1601_v6  ;;  %v1609_v19 = vld [vmem:[#allocation13 + $0x8] sm:$0xff]   ;;  %v1610_v20 = vld [vmem:[#allocation13 + $0x10] sm:$0xff]   ;;  %v1282_v24 = vld [vmem:[#allocation8] ss:$0 sm:$0xff] }
 0x16c   :  { %1429 = vmatprep.subr.bf16.mxu0 %v2160_v0  ;;  %1449 = vmatprep.subr.bf16.mxu1 %v2160_v0  ;;  %v1613_v23 = vld [vmem:[#allocation13 + $0x28] sm:$0xff]   ;;  %v1614_v32 = vld [vmem:[#allocation13 + $0x30] sm:$0xff]   ;;  %v1615_v33 = vld [vmem:[#allocation13 + $0x38] sm:$0xff]   ;;  %p2078_p8 = pnand %p2077_p7, %p2071_p4 }
 0x16d   :  { %v1616_v34 = vld [vmem:[#allocation16] ss:$8 sps:$4 sm:$0xff]   ;;  %v1618_v35 = vld [vmem:[#allocation16 + $0x4] ss:$8 sps:$4 sm:$0xff]   ;;  %v1621_v36 = vld [vmem:[#allocation16 + $0x14] ss:$8 sps:$4 sm:$0xff]  }
 0x16e   :  { %v1619_v37 = vld [vmem:[#allocation16 + $0x10] ss:$8 sps:$4 sm:$0xff]   ;;  %v1624_v38 = vld [vmem:[#allocation16 + $0x24] ss:$8 sps:$4 sm:$0xff]   ;;  %v1622_v39 = vld [vmem:[#allocation16 + $0x20] ss:$8 sps:$4 sm:$0xff]  }
 0x16f   :  { %1430 = vmatpush3.bf16.msra.mxu0 %v1594_v3  ;;  %1450 = vmatpush3.bf16.msra.mxu1 %v1602_v8  ;;  %v1627_v40 = vld [vmem:[#allocation16 + $0x34] ss:$8 sps:$4 sm:$0xff]   ;;  %v1625_v41 = vld [vmem:[#allocation16 + $0x30] ss:$8 sps:$4 sm:$0xff]   ;;  %v1630_v42 = vld [vmem:[#allocation16 + $0x44] ss:$8 sps:$4 sm:$0xff]  }
 0x170   :  { %1431 = vmatprep.subr.bf16.mxu0 %v2160_v0  ;;  %1451 = vmatprep.subr.bf16.mxu1 %v2160_v0  ;;  %v1628_v43 = vld [vmem:[#allocation16 + $0x40] ss:$8 sps:$4 sm:$0xff]   ;;  %v1633_v44 = vld [vmem:[#allocation16 + $0x54] ss:$8 sps:$4 sm:$0xff]   ;;  %v1631_v45 = vld [vmem:[#allocation16 + $0x50] ss:$8 sps:$4 sm:$0xff]  }
 0x171   :  { %v1636_v46 = vld [vmem:[#allocation16 + $0x64] ss:$8 sps:$4 sm:$0xff]   ;;  %v1634_v47 = vld [vmem:[#allocation16 + $0x60] ss:$8 sps:$4 sm:$0xff]   ;;  %v1291_v48 = vld [vmem:[#allocation11] ss:$0 sm:$0xff] }
 0x172   :  { %v1639_v56 = vld [vmem:[#allocation16 + $0x74] ss:$8 sps:$4 sm:$0xff]   ;;  %v1637_v57 = vld [vmem:[#allocation16 + $0x70] ss:$8 sps:$4 sm:$0xff]   ;;  %v1640_v59 = vld [vmem:[#allocation19] sm:$0xff]  }
 0x173   :  { %1432 = vmatpush3.bf16.msra.mxu0 %v1595_v5  ;;  %1452 = vmatpush3.bf16.msra.mxu1 %v1603_v10  ;;  %v1641_v60 = vld [vmem:[#allocation19 + $0x8] sm:$0xff]   ;;  %v1300_v61 = vld [vmem:[#allocation14] ss:$0 sm:$0xff]  ;;  %v1642_v6 = vld [vmem:[#allocation19 + $0x10] sm:$0xff]  }
 0x174   :  { %1433 = vmatprep.subr.bf16.mxu0 %v2160_v0  ;;  %1453 = vmatprep.subr.bf16.mxu1 %v2160_v0  ;;  %v1644_v8 = vld [vmem:[#allocation19 + $0x20] sm:$0xff]   ;;  %v1646_v10 = vld [vmem:[#allocation19 + $0x30] sm:$0xff]  }
 0x177   :  { %1434 = vmatpush3.bf16.msra.mxu0 %v1596_v7  ;;  %1454 = vmatpush3.bf16.msra.mxu1 %v1604_v12  ;;  %v1643_v7 = vld [vmem:[#allocation19 + $0x18] sm:$0xff]   ;;  %v646_v12 = vlaneseq }
 0x178   :  { %1435 = vmatprep.subr.bf16.mxu0 %v2160_v0  ;;  %1455 = vmatprep.subr.bf16.mxu1 %v2160_v0 }
 0x17b   :  { %1436 = vmatpush3.bf16.msra.mxu0 %v1597_v9  ;;  %1456 = vmatpush3.bf16.msra.mxu1 %v1605_v14  ;;  %v1645_v9 = vld [vmem:[#allocation19 + $0x28] sm:$0xff]  }
 0x17c   :  { %1437 = vmatprep.subr.bf16.mxu0 %v2160_v0  ;;  %1457 = vmatprep.subr.bf16.mxu1 %v2160_v0 }
 0x17f   :  { %1438 = vmatpush3.bf16.msra.mxu0 %v1598_v11  ;;  %1458 = vmatpush3.bf16.msra.mxu1 %v1606_v16  ;;  %v1647_v11 = vld [vmem:[#allocation19 + $0x38] sm:$0xff]  }
 0x180   :  { %1439 = vmatprep.subr.bf16.mxu0 %v2160_v0  ;;  %1459 = vmatprep.subr.bf16.mxu1 %v2160_v0 }
 0x183   :  { %1440 = vmatpush3.bf16.msra.mxu0 %v1599_v13  ;;  %1460 = vmatpush3.bf16.msra.mxu1 %v1607_v17  ;;  %v647_v13 = vshrl.u32 %v646_v12, 7 }
 0x184   :  { %1465 = vmatprep.subr.bf16.mxu0 %v2160_v0  ;;  %736 = vmatprep.subr.bf16.mxu1 %v1618_v35 }
 0x185   :  { %v652_v14 = vsub.s32 1, %v647_v13 }
 0x186   :  { %1442 = vmatmul.mubr.bf16.vlgmr.msra.gmra.mrb[0].mxu0 %v288_v15  ;;  %v644_v15 = vld [vmem:[#allocation17] sm:$0x3] }
 0x187   :  { %1481 = vmatprep.mubr.msk.bf16.mxu0 %vm2161_vm0, %v2160_v0  ;;  %1466 = vmatpush3.bf16.msra.mxu0 %v1608_v18  ;;  %v653_v16 = vrot.slane %v644_v15, %v652_v14  ;;  %v1670_v14 = vld [vmem:[#allocation28 + $0x30] sm:$0xff]  }
 0x188   :  { %1467 = vmatprep.subr.bf16.mxu0 %v2160_v0 }
 0x18b   :  { %1468 = vmatpush3.bf16.msra.mxu0 %v1609_v19 }
 0x18c   :  { %1469 = vmatprep.subr.bf16.mxu0 %v2160_v0 }
 0x18f   :  { %1470 = vmatpush3.bf16.msra.mxu0 %v1610_v20 }
 0x190   :  { %1471 = vmatprep.subr.bf16.mxu0 %v2160_v0 }
 0x193   :  { %1472 = vmatpush3.bf16.msra.mxu0 %v1611_v21 }
 0x194   :  { %1473 = vmatprep.subr.bf16.mxu0 %v2160_v0 }
 0x197   :  { %1474 = vmatpush3.bf16.msra.mxu0 %v1612_v22 }
 0x198   :  { %1475 = vmatprep.subr.bf16.mxu0 %v2160_v0 }
 0x19b   :  { %1476 = vmatpush3.bf16.msra.mxu0 %v1613_v23  ;;  %v648_v23 = vsub.s32 0, %v647_v13 }
 0x19c   :  { %1477 = vmatprep.subr.bf16.mxu0 %v2160_v0 }
 0x19f   :  { %1478 = vmatpush3.bf16.msra.mxu0 %v1614_v32 }
 0x1a0   :  { %1479 = vmatprep.subr.bf16.mxu0 %v2160_v0 }
 0x1a3   :  { %1480 = vmatpush3.bf16.msra.mxu0 %v1615_v33 }
 0x1a4   :  { %1485 = vmatprep.subr.bf16.mxu0 %v2160_v0 }
 0x259   :  { %v394_v25 = vpop.f32.mrb[0].mxu0 }
 0x25a   :  { %v395_v26 = vadd.f32 %v1282_v24, %v394_v25  ;;  %v1443_v27 = vpop.f32.mrb[1].mxu0  ;;  %v649_v24 = vrot.slane %v644_v15, %v648_v23  ;;  %v1671_v15 = vld [vmem:[#allocation28 + $0x38] sm:$0xff]  }
 0x25b   :  { %v397_v28 = vpop.f32.mrb[2].mxu0 }
 0x25c   :  { %v400_v29 = vmax.f32 %v395_v26, 0.0  ;;  %v1444_v30 = vpop.f32.mrb[3].mxu0  ;;  %v779_v26 = vld [vmem:[#allocation5] sm:$0xff] }
 0x25e   :  { %v401_v31 = vpack.c.bf16 %v400_v29, %v400_v29 }
 0x260   :  { %1462 = vmatmul.mubr.bf16.vlgmr.msra.gmra.mrb[0].mxu1 %v401_v31 }
 0x261   :  { %737 = vmatpush1.bf16.msra.mxu1 %v1616_v34  ;;  %768 = vmatprep.mubr.bf16.mxu1 %v2162_v58 }
 0x262   :  { %738 = vmatprep.subr.bf16.mxu1 %v1621_v36 }
 0x265   :  { %739 = vmatpush1.bf16.msra.mxu1 %v1619_v37 }
 0x266   :  { %740 = vmatprep.subr.bf16.mxu1 %v1624_v38  ;;  %v1648_v38 = vld [vmem:[#allocation22] sm:$0xff]  }
 0x269   :  { %741 = vmatpush1.bf16.msra.mxu1 %v1622_v39  ;;  %v1649_v39 = vld [vmem:[#allocation22 + $0x8] sm:$0xff]  }
 0x26a   :  { %742 = vmatprep.subr.bf16.mxu1 %v1627_v40  ;;  %v1650_v40 = vld [vmem:[#allocation22 + $0x10] sm:$0xff]  }
 0x26d   :  { %743 = vmatpush1.bf16.msra.mxu1 %v1625_v41  ;;  %v1651_v41 = vld [vmem:[#allocation22 + $0x18] sm:$0xff]  }
 0x26e   :  { %744 = vmatprep.subr.bf16.mxu1 %v1630_v42  ;;  %v1652_v42 = vld [vmem:[#allocation22 + $0x20] sm:$0xff]  }
 0x271   :  { %745 = vmatpush1.bf16.msra.mxu1 %v1628_v43  ;;  %v1653_v43 = vld [vmem:[#allocation22 + $0x28] sm:$0xff]  }
 0x272   :  { %746 = vmatprep.subr.bf16.mxu1 %v1633_v44  ;;  %v1654_v44 = vld [vmem:[#allocation22 + $0x30] sm:$0xff]  }
 0x275   :  { %747 = vmatpush1.bf16.msra.mxu1 %v1631_v45  ;;  %v1655_v45 = vld [vmem:[#allocation22 + $0x38] sm:$0xff]  }
 0x276   :  { %748 = vmatprep.subr.bf16.mxu1 %v1636_v46  ;;  %v1656_v46 = vld [vmem:[#allocation25] sm:$0xff]  }
 0x279   :  { %749 = vmatpush1.bf16.msra.mxu1 %v1634_v47  ;;  %v1657_v47 = vld [vmem:[#allocation25 + $0x8] sm:$0xff]  }
 0x27a   :  { %750 = vmatprep.subr.bf16.mxu1 %v1639_v56 }
 0x27d   :  { %751 = vmatpush1.bf16.msra.mxu1 %v1637_v57 }
 0x27e   :  { %1505 = vmatprep.subr.bf16.mxu1 %v2160_v0 }
 0x333   :  { %v507_v49 = vpop.f32.mrb[0].mxu1 }
 0x334   :  { %v508_v50 = vadd.f32 %v1291_v48, %v507_v49  ;;  %v1463_v51 = vpop.f32.mrb[1].mxu1  ;;  %v1658_v48 = vld [vmem:[#allocation25 + $0x10] sm:$0xff]   ;;  %v1659_v49 = vld [vmem:[#allocation25 + $0x18] sm:$0xff]  }
 0x335   :  { %v510_v52 = vpop.f32.mrb[2].mxu1  ;;  %v1661_v51 = vld [vmem:[#allocation25 + $0x28] sm:$0xff]  }
 0x336   :  { %v513_v53 = vmax.f32 %v508_v50, 0.0  ;;  %v1464_v54 = vpop.f32.mrb[3].mxu1  ;;  %v1660_v50 = vld [vmem:[#allocation25 + $0x20] sm:$0xff]  }
 0x338   :  { %v514_v55 = vpack.c.bf16 %v513_v53, %v513_v53  ;;  %v1326_v53 = vld [vmem:[#allocation20] ss:$0 sm:$0xff] }
 0x33a   :  { %1482 = vmatmul.mubr.bf16.vlgmr.msra.gmra.mrb[4].mxu0 %v514_v55 }
 0x33b   :  { %1501 = vmatprep.mubr.msk.bf16.mxu0 %vm2161_vm0, %v2160_v0  ;;  %1486 = vmatpush3.bf16.msra.mxu0 %v1640_v59 }
 0x33c   :  { %1487 = vmatprep.subr.bf16.mxu0 %v2160_v0 }
 0x33f   :  { %1488 = vmatpush3.bf16.msra.mxu0 %v1641_v60 }
 0x340   :  { %1489 = vmatprep.subr.bf16.mxu0 %v2160_v0 }
 0x343   :  { %1490 = vmatpush3.bf16.msra.mxu0 %v1642_v6  ;;  %v1335_v6 = vld [vmem:[#allocation23] ss:$0 sm:$0xff] }
 0x344   :  { %1491 = vmatprep.subr.bf16.mxu0 %v2160_v0 }
 0x347   :  { %1492 = vmatpush3.bf16.msra.mxu0 %v1643_v7 }
 0x348   :  { %1493 = vmatprep.subr.bf16.mxu0 %v2160_v0 }
 0x34b   :  { %1494 = vmatpush3.bf16.msra.mxu0 %v1644_v8 }
 0x34c   :  { %1495 = vmatprep.subr.bf16.mxu0 %v2160_v0 }
 0x34f   :  { %1496 = vmatpush3.bf16.msra.mxu0 %v1645_v9 }
 0x350   :  { %1497 = vmatprep.subr.bf16.mxu0 %v2160_v0 }
 0x353   :  { %1498 = vmatpush3.bf16.msra.mxu0 %v1646_v10 }
 0x354   :  { %1499 = vmatprep.subr.bf16.mxu0 %v2160_v0 }
 0x357   :  { %1500 = vmatpush3.bf16.msra.mxu0 %v1647_v11 }
 0x358   :  { %1525 = vmatprep.subr.bf16.mxu0 %v2160_v0 }
 0x40d   :  { %v620_v62 = vpop.f32.mrb[4].mxu0 }
 0x40e   :  { %v621_v63 = vadd.f32 %v1300_v61, %v620_v62  ;;  %v1483_v1 = vpop.f32.mrb[5].mxu0  ;;  %v1662_v61 = vld [vmem:[#allocation25 + $0x30] sm:$0xff]   ;;  %v1663_v62 = vld [vmem:[#allocation25 + $0x38] sm:$0xff]  }
 0x40f   :  { %v623_v2 = vpop.f32.mrb[6].mxu0  ;;  %v1665_v1 = vld [vmem:[#allocation28 + $0x8] sm:$0xff]  }
 0x410   :  { %v626_v3 = vmax.f32 %v621_v63, 0.0  ;;  %v1484_v4 = vpop.f32.mrb[7].mxu0  ;;  %v1664_v63 = vld [vmem:[#allocation28] sm:$0xff]   ;;  %v1666_v2 = vld [vmem:[#allocation28 + $0x10] sm:$0xff]  }
 0x411   :  { %v1668_v4 = vld [vmem:[#allocation28 + $0x20] sm:$0xff]  }
 0x412   :  { %v627_v5 = vpack.c.bf16 %v626_v3, %v626_v3  ;;  %v1667_v3 = vld [vmem:[#allocation28 + $0x18] sm:$0xff]  }
 0x414   :  { %769 = vmatmul.mubr.bf16.vlgmr.msra.gmra.mrb[4].mxu1 %v627_v5  ;;  %v1669_v5 = vld [vmem:[#allocation28 + $0x28] sm:$0xff]  }
 0x415   :  { %1521 = vmatprep.mubr.msk.bf16.mxu1 %vm2161_vm0, %v2160_v0  ;;  %1506 = vmatpush3.bf16.msra.mxu1 %v1648_v38 }
 0x416   :  { %1507 = vmatprep.subr.bf16.mxu1 %v2160_v0 }
 0x419   :  { %1508 = vmatpush3.bf16.msra.mxu1 %v1649_v39 }
 0x41a   :  { %1509 = vmatprep.subr.bf16.mxu1 %v2160_v0 }
 0x41d   :  { %1510 = vmatpush3.bf16.msra.mxu1 %v1650_v40 }
 0x41e   :  { %1511 = vmatprep.subr.bf16.mxu1 %v2160_v0 }
 0x421   :  { %1512 = vmatpush3.bf16.msra.mxu1 %v1651_v41 }
 0x422   :  { %1513 = vmatprep.subr.bf16.mxu1 %v2160_v0 }
 0x425   :  { %1514 = vmatpush3.bf16.msra.mxu1 %v1652_v42 }
 0x426   :  { %1515 = vmatprep.subr.bf16.mxu1 %v2160_v0 }
 0x429   :  { %1516 = vmatpush3.bf16.msra.mxu1 %v1653_v43 }
 0x42a   :  { %1517 = vmatprep.subr.bf16.mxu1 %v2160_v0 }
 0x42d   :  { %1518 = vmatpush3.bf16.msra.mxu1 %v1654_v44 }
 0x42e   :  { %1519 = vmatprep.subr.bf16.mxu1 %v2160_v0 }
 0x431   :  { %1520 = vmatpush3.bf16.msra.mxu1 %v1655_v45 }
 0x432   :  { %1545 = vmatprep.subr.bf16.mxu1 %v2160_v0 }
 0x4e7   :  { %v770_v17 = vpop.f32.mrb[4].mxu1 }
 0x4e8   :  { %v772_v18 = vpop.f32.mrb[5].mxu1  ;;  %v771_v25 = vadd.f32 %v770_v17, %v649_v24 }
 0x4e9   :  { %v773_v19 = vadd.f32 %v772_v18, %v653_v16  ;;  %v774_v20 = vpop.f32.mrb[6].mxu1  ;;  %v1344_v16 = vld [vmem:[#allocation26] ss:$0 sm:$0xff] }
 0x4ea   :  { %v775_v21 = vpop.f32.mrb[7].mxu1  ;;  %v782_v28 = vmul.f32 %v771_v25, %v771_v25 }
 0x4eb   :  { %v777_v22 = vmul.f32 1.442695, %v773_v19  ;;  %v785_v31 = vmul.f32 2.0, %v773_v19 }
 0x4ed   :  { %1672 = vpow2.f32 %v777_v22 }
 0x4f7   :  { %v1673_v27 = vpop.eup %1672 }
 0x4f8   :  { %v780_v29 = vmul.f32 %v1673_v27, %v779_v26  ;;  %v783_v30 = vmul.f32 %v1673_v27, %v1673_v27 }
 0x4fa   :  { %v781_v32 = vadd.f32 %v780_v29, %v771_v25  ;;  %v784_v33 = vadd.f32 %v783_v30, %v782_v28 }
 0x4fc   :  { %v792_v34 = vpack.c.bf16 %v781_v32, %v781_v32  ;;  %v786_v35 = vsub.f32 %v784_v33, %v785_v31 }
 0x4fe   :  { %1502 = vmatmul.mubr.bf16.vlgmr.msra.gmra.mrb[8].mxu0 %v792_v34  ;;  %v1325_v36 = vadd.f32 -1.0, %v786_v35 }
 0x4ff   :  { %1541 = vmatprep.mubr.msk.bf16.mxu0 %vm2161_vm0, %v2160_v0  ;;  %1526 = vmatpush3.bf16.msra.mxu0 %v1656_v46 }
 0x500   :  { %v788_v37 = vmul.f32 0.5, %v1325_v36  ;;  %1527 = vmatprep.subr.bf16.mxu0 %v2160_v0 }
 0x502   :  { %789 = vadd.xlane.f32.xlu0 %v788_v37 }
 0x503   :  { %1528 = vmatpush3.bf16.msra.mxu0 %v1657_v47 }
 0x504   :  { %1529 = vmatprep.subr.bf16.mxu0 %v2160_v0 }
 0x507   :  { %1530 = vmatpush3.bf16.msra.mxu0 %v1658_v48 }
 0x508   :  { %1531 = vmatprep.subr.bf16.mxu0 %v2160_v0 }
 0x50b   :  { %1532 = vmatpush3.bf16.msra.mxu0 %v1659_v49 }
 0x50c   :  { %1533 = vmatprep.subr.bf16.mxu0 %v2160_v0 }
 0x50f   :  { %1534 = vmatpush3.bf16.msra.mxu0 %v1660_v50 }
 0x510   :  { %1535 = vmatprep.subr.bf16.mxu0 %v2160_v0 }
 0x513   :  { %1536 = vmatpush3.bf16.msra.mxu0 %v1661_v51 }
 0x514   :  { %1537 = vmatprep.subr.bf16.mxu0 %v2160_v0 }
 0x517   :  { %1538 = vmatpush3.bf16.msra.mxu0 %v1662_v61 }
 0x518   :  { %1539 = vmatprep.subr.bf16.mxu0 %v2160_v0 }
 0x51b   :  { %1540 = vmatpush3.bf16.msra.mxu0 %v1663_v62 }
 0x58f   :  { %v790_v52 = vpop.xlane.xlu0 %789 }
 0x590   :  { %791 = vst [vmem:[#allocation32] sm:$0xff] %v790_v52 }
 0x5d1   :  { %v898_v54 = vpop.f32.mrb[8].mxu0 }
 0x5d2   :  { %v899_v55 = vadd.f32 %v1326_v53, %v898_v54  ;;  %v1503_v56 = vpop.f32.mrb[9].mxu0 }
 0x5d3   :  { %v901_v57 = vpop.f32.mrb[10].mxu0 }
 0x5d4   :  { %v904_v58 = vmax.f32 %v899_v55, 0.0  ;;  %v1504_v59 = vpop.f32.mrb[11].mxu0 }
 0x5d6   :  { %v905_v60 = vpack.c.bf16 %v904_v58, %v904_v58 }
 0x5d8   :  { %1522 = vmatmul.mubr.bf16.vlgmr.msra.gmra.mrb[8].mxu1 %v905_v60 }
 0x5d9   :  { %1561 = vmatprep.mubr.msk.bf16.mxu1 %vm2161_vm0, %v2160_v0  ;;  %1546 = vmatpush3.bf16.msra.mxu1 %v1664_v63 }
 0x5da   :  { %1547 = vmatprep.subr.bf16.mxu1 %v2160_v0 }
 0x5dd   :  { %1548 = vmatpush3.bf16.msra.mxu1 %v1665_v1 }
 0x5de   :  { %1549 = vmatprep.subr.bf16.mxu1 %v2160_v0 }
 0x5e1   :  { %1550 = vmatpush3.bf16.msra.mxu1 %v1666_v2 }
 0x5e2   :  { %1551 = vmatprep.subr.bf16.mxu1 %v2160_v0 }
 0x5e5   :  { %1552 = vmatpush3.bf16.msra.mxu1 %v1667_v3 }
 0x5e6   :  { %1553 = vmatprep.subr.bf16.mxu1 %v2160_v0 }
 0x5e9   :  { %1554 = vmatpush3.bf16.msra.mxu1 %v1668_v4 }
 0x5ea   :  { %1555 = vmatprep.subr.bf16.mxu1 %v2160_v0 }
 0x5ed   :  { %1556 = vmatpush3.bf16.msra.mxu1 %v1669_v5 }
 0x5ee   :  { %1557 = vmatprep.subr.bf16.mxu1 %v2160_v0 }
 0x5f1   :  { %1558 = vmatpush3.bf16.msra.mxu1 %v1670_v14 }
 0x5f2   :  { %1559 = vmatprep.subr.bf16.mxu1 %v2160_v0 }
 0x5f5   :  { %1560 = vmatpush3.bf16.msra.mxu1 %v1671_v15 }
 0x6ab   :  { %v1011_v7 = vpop.f32.mrb[8].mxu1 }
 0x6ac   :  { %v1012_v8 = vadd.f32 %v1335_v6, %v1011_v7  ;;  %v1523_v9 = vpop.f32.mrb[9].mxu1 }
 0x6ad   :  { %v1014_v10 = vpop.f32.mrb[10].mxu1 }
 0x6ae   :  { %v1017_v11 = vmax.f32 %v1012_v8, 0.0  ;;  %v1524_v12 = vpop.f32.mrb[11].mxu1 }
 0x6b0   :  { %v1018_v13 = vpack.c.bf16 %v1017_v11, %v1017_v11 }
 0x6b2   :  { %1542 = vmatmul.mubr.bf16.vlgmr.msra.gmra.mrb[12].mxu0 %v1018_v13 }
 0x785   :  { %v1124_v17 = vpop.f32.mrb[12].mxu0 }
 0x786   :  { %v1125_v18 = vadd.f32 %v1344_v16, %v1124_v17  ;;  %v1543_v19 = vpop.f32.mrb[13].mxu0 }
 0x787   :  { %v1127_v20 = vpop.f32.mrb[14].mxu0 }
 0x788   :  { %v1130_v21 = vmax.f32 %v1125_v18, 0.0  ;;  %v1544_v22 = vpop.f32.mrb[15].mxu0 }
 0x78a   :  { %v1131_v23 = vpack.c.bf16 %v1130_v21, %v1130_v21 }
 0x78c   :  { %1562 = vmatmul.mubr.bf16.vlgmr.msra.gmra.mrb[12].mxu1 %v1131_v23 }
 0x78d   :  { %2081 = shalt.err (!%p2078_p8)
}
 0x78e   :  { %s2082_s13 = scalar_lea.hbm %s2629_s19, 128 }
 0x78f   :  { %p2083_p9 = scmp.ne.s32.totalorder %s2629_s19, %s2082_s13  ;;  %p2086_p10 = scmp.lt.u32.totalorder %s2082_s13, %s2629_s19 }
 0x791   :  { %p2088_p11 = pnand %p2086_p10, %p2083_p9 }
 0x793   :  { %2091 = shalt.err (!%p2088_p11)
}
 0x794   :  { %1263 = dma.vmem_to_hbm [thread:$0]  %s1261_s4, 128, %s2629_s19, [#allocation33]   ;;  %v1353_v0 = vld [vmem:[#allocation29] ss:$0 sm:$0xff] }
 0x795   :  { %s2164_s21 = smov [#allocation31]  }
 0x796   :  { %s1250_s11 = sshll.u32 %s2164_s21, 4  ;;  %s1251_s11 = int_to_ptr.vmem [resolvable:$true] %s1250_s11 }
 0x797   :  { %s2092_s14 = scalar_lea.vmem %s1251_s11, 128  ;;  %p2097_p13 = scmp.lt.s32.totalorder %s1251_s11, %s1251_s11 }
 0x798   :  { %p2093_p12 = scmp.ne.s32.totalorder %s1251_s11, %s2092_s14  ;;  %p2098_p0 = scmp.lt.s32.totalorder %s2092_s14, %s2092_s14 }
 0x79a   :  { %p2099_p1 = por %p2098_p0, %p2097_p13 }
 0x79c   :  { %p2100_p2 = pnand %p2099_p1, %p2093_p12 }
 0x85f   :  { %v1237_v24 = vpop.f32.mrb[12].mxu1 }
 0x860   :  { %v1238_v25 = vadd.f32 %v1353_v0, %v1237_v24  ;;  %v1563_v26 = vpop.f32.mrb[13].mxu1 }
 0x861   :  { %v1240_v27 = vpop.f32.mrb[14].mxu1 }
 0x862   :  { %1243 = vst [vmem:[#allocation31] sm:$0xff] %v1238_v25  ;;  %v1564_v28 = vpop.f32.mrb[15].mxu1 }
 0x863   :  { %2103 = shalt.err (!%p2100_p2)
}
 0x864   :  { %s2104_s19 = scalar_lea.hbm %s2628_s18, 128 }
 0x865   :  { %p2105_p3 = scmp.ne.s32.totalorder %s2628_s18, %s2104_s19  ;;  %p2108_p4 = scmp.lt.u32.totalorder %s2104_s19, %s2628_s18 }
 0x867   :  { %p2110_p5 = pnand %p2108_p4, %p2105_p3 }
 0x869   :  { %2113 = shalt.err (!%p2110_p5)
}
 0x86a   :  { %1253 = dma.vmem_to_hbm [thread:$0]  %s1251_s11, 128, %s2628_s18, [#allocation4]  }
 0x86b   :  { %2134 = dma.done.wait [#allocation4], 128  }
 0x86c   :  { %2135 = vsyncadd [#allocation4], 4294967168 }
 0x86d   :  { %2136 = dma.done.wait [#allocation33], 128  }
 0x86e   :  { %2137 = vsyncadd [#allocation33], 4294967168 }
 0x86f   :  { %1270 = vsyncpa [#allocation3], 1 }
 0x870   :  { %1271 = vsyncpa [#allocation6], 1 }
 0x871   :  { %1272 = vsyncpa [#allocation9], 1 }
 0x872   :  { %1273 = vsyncpa [#allocation12], 1 }
 0x873   :  { %1274 = vsyncpa [#allocation15], 1 }
 0x874   :  { %1275 = vsyncpa [#allocation18], 1 }
 0x875   :  { %1276 = vsyncpa [#allocation21], 1 }
 0x876   :  { %1277 = vsyncpa [#allocation24], 1 }
 0x877   :  { %1278 = vsyncpa [#allocation27], 1 }
 0x878   :  { %1279 = vsyncpa [#allocation30], 1 }
 0x879   :  { %1280 = vsyncpa [#allocation4], 1 }
 0x87a   :  { %1281 = vsyncpa [#allocation33], 1 }

// kernel: tpu_custom_call.1
= control target key start
LH: loop header
LB: loop body
LE: loop exit
PB: predicated region body
PF: predicated region fallthrough
CT: control target
= control target key end

     0   :  { %s2610_s0 = inlined_call_operand.hbm [shape: bf16[8,128], index: 0, kind: input, shape index: {}]   ;;  %s2611_s1 = inlined_call_operand.hbm [shape: f32[8,128], index: 1, kind: input, shape index: {}]   ;;  %s2612_s2 = inlined_call_operand.hbm [shape: bf16[128,128], index: 2, kind: input, shape index: {}]   ;;  %s2613_s3 = inlined_call_operand.hbm [shape: f32[1,128], index: 3, kind: input, shape index: {}]   ;;  %s2614_s4 = inlined_call_operand.hbm [shape: bf16[128,128], index: 4, kind: input, shape index: {}]   ;;  %s2615_s5 = inlined_call_operand.hbm [shape: f32[1,128], index: 5, kind: input, shape index: {}]   ;;  %s2616_s6 = inlined_call_operand.hbm [shape: bf16[128,128], index: 6, kind: input, shape index: {}]   ;;  %s2617_s7 = inlined_call_operand.hbm [shape: f32[1,128], index: 7, kind: input, shape index: {}]   ;;  %s2618_s8 = inlined_call_operand.hbm [shape: bf16[128,256], index: 8, kind: input, shape index: {}]   ;;  %s2619_s9 = inlined_call_operand.hbm [shape: f32[1,256], index: 9, kind: input, shape index: {}]   ;;  %s2620_s10 = inlined_call_operand.hbm [shape: bf16[128,128], index: 10, kind: input, shape index: {}]   ;;  %s2621_s11 = inlined_call_operand.hbm [shape: f32[1,128], index: 11, kind: input, shape index: {}]   ;;  %s2622_s12 = inlined_call_operand.hbm [shape: bf16[128,128], index: 12, kind: input, shape index: {}]   ;;  %s2623_s13 = inlined_call_operand.hbm [shape: f32[1,128], index: 13, kind: input, shape index: {}]   ;;  %s2624_s14 = inlined_call_operand.hbm [shape: bf16[128,128], index: 14, kind: input, shape index: {}]   ;;  %s2625_s15 = inlined_call_operand.hbm [shape: f32[1,128], index: 15, kind: input, shape index: {}]   ;;  %s2626_s16 = inlined_call_operand.hbm [shape: bf16[128,128], index: 16, kind: input, shape index: {}]   ;;  %s2627_s17 = inlined_call_operand.hbm [shape: f32[1,128], index: 17, kind: input, shape index: {}]   ;;  %s2628_s18 = inlined_call_operand.hbm [shape: f32[8,128], index: 18, kind: output, shape index: {0}]   ;;  %s2629_s19 = inlined_call_operand.hbm [shape: f32[8,128], index: 19, kind: output, shape index: {1}]  }
   0x1   :  { %2634 = sst [smem:[#allocation46_spill]] %s2610_s0 }
   0x2   :  { %2635 = sst [smem:[#allocation47_spill]] %s2611_s1 }
   0x3   :  { %2636 = sst [smem:[#allocation48_spill]] %s2612_s2 }
   0x4   :  { %2637 = sst [smem:[#allocation49_spill]] %s2613_s3 }
   0x5   :  { %25 = vsyncpa [#allocation3], 0 }
   0x6   :  { %26 = vsyncpa [#allocation6], 0 }
   0x7   :  { %27 = vsyncpa [#allocation9], 0 }
   0x8   :  { %28 = vsyncpa [#allocation12], 0 }
   0x9   :  { %29 = vsyncpa [#allocation15], 0 }
   0xa   :  { %30 = vsyncpa [#allocation18], 0 }
   0xb   :  { %31 = vsyncpa [#allocation21], 0 }
   0xc   :  { %32 = vsyncpa [#allocation24], 0 }
   0xd   :  { %33 = vsyncpa [#allocation27], 0 }
   0xe   :  { %34 = vsyncpa [#allocation30], 0 }
   0xf   :  { %35 = vsyncpa [#allocation4], 0 }
  0x10   :  { %36 = vsyncpa [#allocation33], 0  ;;  %s2138_s0 = smov [#allocation5]   ;;  %s2139_s20 = smov [#allocation8]  }
  0x11   :  { %s53_s30 = sshll.u32 %s2138_s0, 4  ;;  %s75_s21 = sshll.u32 %s2139_s20, 4  ;;  %s54_s30 = int_to_ptr.vmem [resolvable:$true] %s53_s30  ;;  %s76_s21 = int_to_ptr.vmem [resolvable:$true] %s75_s21 }
  0x12   :  { %s2638_s2 = sld [smem:[#allocation47_spill]] }
  0x18   :  { %s1674_s23 = scalar_lea.hbm %s2638_s2, 128 }
  0x19   :  { %p1675_p0 = scmp.ne.s32.totalorder %s2638_s2, %s1674_s23  ;;  %p1678_p1 = scmp.lt.u32.totalorder %s1674_s23, %s2638_s2 }
  0x1b   :  { %p1680_p2 = pnand %p1678_p1, %p1675_p0 }
  0x1d   :  { %1683 = shalt.err (!%p1680_p2)
}
  0x1e   :  { %s1684_s27 = scalar_lea.vmem %s54_s30, 128  ;;  %p1689_p4 = scmp.lt.s32.totalorder %s54_s30, %s54_s30 }
  0x1f   :  { %p1685_p3 = scmp.ne.s32.totalorder %s54_s30, %s1684_s27  ;;  %p1690_p5 = scmp.lt.s32.totalorder %s1684_s27, %s1684_s27 }
  0x21   :  { %p1691_p6 = por %p1690_p5, %p1689_p4 }
  0x23   :  { %p1692_p7 = pnand %p1691_p6, %p1685_p3 }
  0x25   :  { %1695 = shalt.err (!%p1692_p7)
}
  0x26   :  { %56 = dma.hbm_to_vmem [thread:$0]  %s2638_s2, 128, %s54_s30, [#allocation6]  }
  0x27   :  { %s2639_s1 = sld [smem:[#allocation49_spill]] }
  0x2d   :  { %s1696_s22 = scalar_lea.hbm %s2639_s1, 16 }
  0x2e   :  { %p1697_p8 = scmp.ne.s32.totalorder %s2639_s1, %s1696_s22  ;;  %p1700_p9 = scmp.lt.u32.totalorder %s1696_s22, %s2639_s1 }
  0x30   :  { %p1702_p10 = pnand %p1700_p9, %p1697_p8 }
  0x32   :  { %1705 = shalt.err (!%p1702_p10)
}
  0x33   :  { %s1706_s26 = scalar_lea.vmem %s76_s21, 16  ;;  %s1710_s27 = scalar_lea.vmem %s76_s21, 32 }
  0x34   :  { %p1707_p11 = scmp.ne.s32.totalorder %s76_s21, %s1706_s26  ;;  %p1711_p12 = scmp.lt.s32.totalorder %s76_s21, %s76_s21 }
  0x35   :  { %p1712_p13 = scmp.lt.s32.totalorder %s1710_s27, %s1706_s26 }
  0x37   :  { %p1713_p0 = por %p1712_p13, %p1711_p12 }
  0x39   :  { %p1714_p1 = pnand %p1713_p0, %p1707_p11 }
  0x3b   :  { %1717 = shalt.err (!%p1714_p1)
}
  0x3c   :  { %78 = dma.hbm_to_vmem [thread:$0]  %s2639_s1, 16, %s76_s21, [#allocation9]  }
  0x3d   :  { %s2140_s28 = smov [#allocation11]   ;;  %s2141_s0 = smov [#allocation14]  }
  0x3e   :  { %s97_s29 = sshll.u32 %s2140_s28, 4  ;;  %s119_s20 = sshll.u32 %s2141_s0, 4  ;;  %s98_s29 = int_to_ptr.vmem [resolvable:$true] %s97_s29  ;;  %s120_s20 = int_to_ptr.vmem [resolvable:$true] %s119_s20 }
  0x3f   :  { %s1718_s25 = scalar_lea.hbm %s2615_s5, 16 }
  0x40   :  { %p1719_p2 = scmp.ne.s32.totalorder %s2615_s5, %s1718_s25  ;;  %p1722_p3 = scmp.lt.u32.totalorder %s1718_s25, %s2615_s5 }
  0x42   :  { %p1724_p4 = pnand %p1722_p3, %p1719_p2 }
  0x44   :  { %1727 = shalt.err (!%p1724_p4)
}
  0x45   :  { %s1728_s21 = scalar_lea.vmem %s98_s29, 16  ;;  %s1732_s1 = scalar_lea.vmem %s98_s29, 32 }
  0x46   :  { %p1729_p5 = scmp.ne.s32.totalorder %s98_s29, %s1728_s21  ;;  %p1733_p6 = scmp.lt.s32.totalorder %s98_s29, %s98_s29 }
  0x47   :  { %p1734_p7 = scmp.lt.s32.totalorder %s1732_s1, %s1728_s21 }
  0x49   :  { %p1735_p8 = por %p1734_p7, %p1733_p6 }
  0x4b   :  { %p1736_p9 = pnand %p1735_p8, %p1729_p5 }
  0x4d   :  { %1739 = shalt.err (!%p1736_p9)
}
  0x4e   :  { %100 = dma.hbm_to_vmem [thread:$0]  %s2615_s5, 16, %s98_s29, [#allocation12]  }
  0x4f   :  { %s1740_s22 = scalar_lea.hbm %s2617_s7, 16 }
  0x50   :  { %p1741_p10 = scmp.ne.s32.totalorder %s2617_s7, %s1740_s22  ;;  %p1744_p11 = scmp.lt.u32.totalorder %s1740_s22, %s2617_s7 }
  0x52   :  { %p1746_p12 = pnand %p1744_p11, %p1741_p10 }
  0x54   :  { %1749 = shalt.err (!%p1746_p12)
}
  0x55   :  { %s1750_s26 = scalar_lea.vmem %s120_s20, 16  ;;  %s1754_s27 = scalar_lea.vmem %s120_s20, 32 }
  0x56   :  { %p1751_p13 = scmp.ne.s32.totalorder %s120_s20, %s1750_s26  ;;  %p1755_p0 = scmp.lt.s32.totalorder %s120_s20, %s120_s20 }
  0x57   :  { %p1756_p1 = scmp.lt.s32.totalorder %s1754_s27, %s1750_s26 }
  0x59   :  { %p1757_p2 = por %p1756_p1, %p1755_p0 }
  0x5b   :  { %p1758_p3 = pnand %p1757_p2, %p1751_p13 }
  0x5d   :  { %1761 = shalt.err (!%p1758_p3)
}
  0x5e   :  { %122 = dma.hbm_to_vmem [thread:$0]  %s2617_s7, 16, %s120_s20, [#allocation15]  }
  0x5f   :  { %s2142_s21 = smov [#allocation17]   ;;  %s2143_s30 = smov [#allocation20]  }
  0x60   :  { %s141_s1 = sshll.u32 %s2142_s21, 4  ;;  %s163_s2 = sshll.u32 %s2143_s30, 4  ;;  %s142_s1 = int_to_ptr.vmem [resolvable:$true] %s141_s1  ;;  %s164_s2 = int_to_ptr.vmem [resolvable:$true] %s163_s2 }
  0x61   :  { %s1762_s22 = scalar_lea.hbm %s2619_s9, 32 }
  0x62   :  { %p1763_p4 = scmp.ne.s32.totalorder %s2619_s9, %s1762_s22  ;;  %p1766_p5 = scmp.lt.u32.totalorder %s1762_s22, %s2619_s9 }
  0x64   :  { %p1768_p6 = pnand %p1766_p5, %p1763_p4 }
  0x66   :  { %1771 = shalt.err (!%p1768_p6)
}
  0x67   :  { %s1772_s7 = scalar_lea.vmem %s142_s1, 32  ;;  %p1777_p8 = scmp.lt.s32.totalorder %s142_s1, %s142_s1 }
  0x68   :  { %p1773_p7 = scmp.ne.s32.totalorder %s142_s1, %s1772_s7  ;;  %p1778_p9 = scmp.lt.s32.totalorder %s1772_s7, %s1772_s7 }
  0x6a   :  { %p1779_p10 = por %p1778_p9, %p1777_p8 }
  0x6c   :  { %p1780_p11 = pnand %p1779_p10, %p1773_p7 }
  0x6e   :  { %1783 = shalt.err (!%p1780_p11)
}
  0x6f   :  { %144 = dma.hbm_to_vmem [thread:$0]  %s2619_s9, 32, %s142_s1, [#allocation18]  }
  0x70   :  { %s1784_s29 = scalar_lea.hbm %s2621_s11, 16 }
  0x71   :  { %p1785_p12 = scmp.ne.s32.totalorder %s2621_s11, %s1784_s29  ;;  %p1788_p13 = scmp.lt.u32.totalorder %s1784_s29, %s2621_s11 }
  0x73   :  { %p1790_p0 = pnand %p1788_p13, %p1785_p12 }
  0x75   :  { %1793 = shalt.err (!%p1790_p0)
}
  0x76   :  { %s1794_s22 = scalar_lea.vmem %s164_s2, 16  ;;  %s1798_s24 = scalar_lea.vmem %s164_s2, 32 }
  0x77   :  { %p1795_p1 = scmp.ne.s32.totalorder %s164_s2, %s1794_s22  ;;  %p1799_p2 = scmp.lt.s32.totalorder %s164_s2, %s164_s2 }
  0x78   :  { %p1800_p3 = scmp.lt.s32.totalorder %s1798_s24, %s1794_s22 }
  0x7a   :  { %p1801_p4 = por %p1800_p3, %p1799_p2 }
  0x7c   :  { %p1802_p5 = pnand %p1801_p4, %p1795_p1 }
  0x7e   :  { %1805 = shalt.err (!%p1802_p5)
}
  0x7f   :  { %166 = dma.hbm_to_vmem [thread:$0]  %s2621_s11, 16, %s164_s2, [#allocation21]  }
  0x80   :  { %s2144_s25 = smov [#allocation23]   ;;  %s2145_s3 = smov [#allocation26]  }
  0x81   :  { %s185_s23 = sshll.u32 %s2144_s25, 4  ;;  %s207_s7 = sshll.u32 %s2145_s3, 4  ;;  %s186_s23 = int_to_ptr.vmem [resolvable:$true] %s185_s23  ;;  %s208_s7 = int_to_ptr.vmem [resolvable:$true] %s207_s7 }
  0x82   :  { %s1806_s27 = scalar_lea.hbm %s2623_s13, 16 }
  0x83   :  { %p1807_p6 = scmp.ne.s32.totalorder %s2623_s13, %s1806_s27  ;;  %p1810_p7 = scmp.lt.u32.totalorder %s1806_s27, %s2623_s13 }
  0x85   :  { %p1812_p8 = pnand %p1810_p7, %p1807_p6 }
  0x87   :  { %1815 = shalt.err (!%p1812_p8)
}
  0x88   :  { %s1816_s11 = scalar_lea.vmem %s186_s23, 16  ;;  %s1820_s2 = scalar_lea.vmem %s186_s23, 32 }
  0x89   :  { %p1817_p9 = scmp.ne.s32.totalorder %s186_s23, %s1816_s11  ;;  %p1821_p10 = scmp.lt.s32.totalorder %s186_s23, %s186_s23 }
  0x8a   :  { %p1822_p11 = scmp.lt.s32.totalorder %s1820_s2, %s1816_s11 }
  0x8c   :  { %p1823_p12 = por %p1822_p11, %p1821_p10 }
  0x8e   :  { %p1824_p13 = pnand %p1823_p12, %p1817_p9 }
  0x90   :  { %1827 = shalt.err (!%p1824_p13)
}
  0x91   :  { %188 = dma.hbm_to_vmem [thread:$0]  %s2623_s13, 16, %s186_s23, [#allocation24]  }
  0x92   :  { %s1828_s9 = scalar_lea.hbm %s2625_s15, 16 }
  0x93   :  { %p1829_p0 = scmp.ne.s32.totalorder %s2625_s15, %s1828_s9  ;;  %p1832_p1 = scmp.lt.u32.totalorder %s1828_s9, %s2625_s15 }
  0x95   :  { %p1834_p2 = pnand %p1832_p1, %p1829_p0 }
  0x97   :  { %1837 = shalt.err (!%p1834_p2)
}
  0x98   :  { %s1838_s26 = scalar_lea.vmem %s208_s7, 16  ;;  %s1842_s27 = scalar_lea.vmem %s208_s7, 32 }
  0x99   :  { %p1839_p3 = scmp.ne.s32.totalorder %s208_s7, %s1838_s26  ;;  %p1843_p4 = scmp.lt.s32.totalorder %s208_s7, %s208_s7 }
  0x9a   :  { %p1844_p5 = scmp.lt.s32.totalorder %s1842_s27, %s1838_s26 }
  0x9c   :  { %p1845_p6 = por %p1844_p5, %p1843_p4 }
  0x9e   :  { %p1846_p7 = pnand %p1845_p6, %p1839_p3 }
  0xa0   :  { %1849 = shalt.err (!%p1846_p7)
}
  0xa1   :  { %210 = dma.hbm_to_vmem [thread:$0]  %s2625_s15, 16, %s208_s7, [#allocation27]  }
  0xa2   :  { %s2146_s5 = smov [#allocation2]   ;;  %s2147_s21 = smov [#allocation7]  }
  0xa3   :  { %s43_s29 = sshll.u32 %s2146_s5, 4  ;;  %s62_s30 = sshll.u32 %s2147_s21, 4  ;;  %s44_s29 = int_to_ptr.vmem [resolvable:$true] %s43_s29  ;;  %s2361_s30 = int_to_ptr.vmem [resolvable:$true] %s62_s30 }
  0xa4   :  { %s2640_s28 = sld [smem:[#allocation46_spill]] }
  0xaa   :  { %s1850_s0 = scalar_lea.hbm %s2640_s28, 64 }
  0xab   :  { %p1851_p8 = scmp.ne.s32.totalorder %s2640_s28, %s1850_s0  ;;  %p1854_p9 = scmp.lt.u32.totalorder %s1850_s0, %s2640_s28 }
  0xad   :  { %p1856_p10 = pnand %p1854_p9, %p1851_p8 }
  0xaf   :  { %1859 = shalt.err (!%p1856_p10)
}
  0xb0   :  { %s1860_s15 = scalar_lea.vmem %s44_s29, 64  ;;  %p1865_p12 = scmp.lt.s32.totalorder %s44_s29, %s44_s29 }
  0xb1   :  { %p1861_p11 = scmp.ne.s32.totalorder %s44_s29, %s1860_s15  ;;  %p1866_p13 = scmp.lt.s32.totalorder %s1860_s15, %s1860_s15 }
  0xb3   :  { %p1867_p0 = por %p1866_p13, %p1865_p12 }
  0xb5   :  { %p1868_p1 = pnand %p1867_p0, %p1861_p11 }
  0xb7   :  { %1871 = shalt.err (!%p1868_p1)
}
  0xb8   :  { %46 = dma.hbm_to_vmem [thread:$0]  %s2640_s28, 64, %s44_s29, [#allocation3]  }
  0xb9   :  { %s2641_s26 = sld [smem:[#allocation48_spill]] }
  0xbf   :  { %s1872_s27 = scalar_lea.hbm %s2641_s26, 1024 }
  0xc0   :  { %p1873_p2 = scmp.ne.s32.totalorder %s2641_s26, %s1872_s27  ;;  %p1876_p3 = scmp.lt.u32.totalorder %s1872_s27, %s2641_s26 }
  0xc2   :  { %p1878_p4 = pnand %p1876_p3, %p1873_p2 }
  0xc4   :  { %1881 = shalt.err (!%p1878_p4)
}
  0xc5   :  { %s1882_s11 = scalar_lea.vmem %s2361_s30, 1024  ;;  %p1887_p6 = scmp.lt.s32.totalorder %s2361_s30, %s2361_s30 }
  0xc6   :  { %p1883_p5 = scmp.ne.s32.totalorder %s2361_s30, %s1882_s11  ;;  %p1888_p7 = scmp.lt.s32.totalorder %s1882_s11, %s1882_s11 }
  0xc8   :  { %p1889_p8 = por %p1888_p7, %p1887_p6 }
  0xca   :  { %p1890_p9 = pnand %p1889_p8, %p1883_p5 }
  0xcc   :  { %1893 = shalt.err (!%p1890_p9)
}
  0xcd   :  { %s2148_s29 = smov 64   ;;  %s2149_s2 = smov 4  }
  0xce   :  { %68 = dma.hbm_to_vmem [thread:$0]  %s2641_s26, 1024, %s2361_s30, [#allocation6], %s2148_s29, %s2148_s29, %s2149_s2  }
  0xcf   :  { %s2150_s22 = smov [#allocation10]   ;;  %s2151_s9 = smov [#allocation13]  }
  0xd0   :  { %s84_s24 = sshll.u32 %s2150_s22, 4  ;;  %s106_s1 = sshll.u32 %s2151_s9, 4  ;;  %s85_s24 = int_to_ptr.vmem [resolvable:$true] %s84_s24  ;;  %s2395_s1 = int_to_ptr.vmem [resolvable:$true] %s106_s1 }
  0xd1   :  { %s1894_s25 = scalar_lea.hbm %s2614_s4, 1024 }
  0xd2   :  { %p1895_p10 = scmp.ne.s32.totalorder %s2614_s4, %s1894_s25  ;;  %p1898_p11 = scmp.lt.u32.totalorder %s1894_s25, %s2614_s4 }
  0xd4   :  { %p1900_p12 = pnand %p1898_p11, %p1895_p10 }
  0xd6   :  { %1903 = shalt.err (!%p1900_p12)
}
  0xd7   :  { %s1904_s30 = scalar_lea.vmem %s85_s24, 1024  ;;  %p1909_p0 = scmp.lt.s32.totalorder %s85_s24, %s85_s24 }
  0xd8   :  { %p1905_p13 = scmp.ne.s32.totalorder %s85_s24, %s1904_s30  ;;  %p1910_p1 = scmp.lt.s32.totalorder %s1904_s30, %s1904_s30 }
  0xda   :  { %p1911_p2 = por %p1910_p1, %p1909_p0 }
  0xdc   :  { %p1912_p3 = pnand %p1911_p2, %p1905_p13 }
  0xde   :  { %1915 = shalt.err (!%p1912_p3)
}
  0xdf   :  { %90 = dma.hbm_to_vmem [thread:$0]  %s2614_s4, 1024, %s85_s24, [#allocation9], %s2148_s29, %s2148_s29, %s2149_s2  }
  0xe0   :  { %s1916_s11 = scalar_lea.hbm %s2616_s6, 1024 }
  0xe1   :  { %p1917_p4 = scmp.ne.s32.totalorder %s2616_s6, %s1916_s11  ;;  %p1920_p5 = scmp.lt.u32.totalorder %s1916_s11, %s2616_s6 }
  0xe3   :  { %p1922_p6 = pnand %p1920_p5, %p1917_p4 }
  0xe5   :  { %1925 = shalt.err (!%p1922_p6)
}
  0xe6   :  { %s1926_s15 = scalar_lea.vmem %s2395_s1, 1024  ;;  %p1931_p8 = scmp.lt.s32.totalorder %s2395_s1, %s2395_s1 }
  0xe7   :  { %p1927_p7 = scmp.ne.s32.totalorder %s2395_s1, %s1926_s15  ;;  %p1932_p9 = scmp.lt.s32.totalorder %s1926_s15, %s1926_s15 }
  0xe9   :  { %p1933_p10 = por %p1932_p9, %p1931_p8 }
  0xeb   :  { %p1934_p11 = pnand %p1933_p10, %p1927_p7 }
  0xed   :  { %1937 = shalt.err (!%p1934_p11)
}
  0xee   :  { %112 = dma.hbm_to_vmem [thread:$0]  %s2616_s6, 1024, %s2395_s1, [#allocation12], %s2148_s29, %s2148_s29, %s2149_s2  }
  0xef   :  { %s2152_s7 = smov [#allocation16]   ;;  %s1938_s27 = scalar_lea.hbm %s2618_s8, 2048 }
  0xf0   :  { %s128_s25 = sshll.u32 %s2152_s7, 4  ;;  %p1939_p12 = scmp.ne.s32.totalorder %s2618_s8, %s1938_s27  ;;  %s129_s25 = int_to_ptr.vmem [resolvable:$true] %s128_s25 }
  0xf1   :  { %p1942_p13 = scmp.lt.u32.totalorder %s1938_s27, %s2618_s8 }
  0xf3   :  { %p1944_p0 = pnand %p1942_p13, %p1939_p12 }
  0xf5   :  { %1947 = shalt.err (!%p1944_p0)
}
  0xf6   :  { %s1948_s5 = scalar_lea.vmem %s129_s25, 2048  ;;  %p1953_p2 = scmp.lt.s32.totalorder %s129_s25, %s129_s25 }
  0xf7   :  { %p1949_p1 = scmp.ne.s32.totalorder %s129_s25, %s1948_s5  ;;  %p1954_p3 = scmp.lt.s32.totalorder %s1948_s5, %s1948_s5 }
  0xf9   :  { %p1955_p4 = por %p1954_p3, %p1953_p2 }
  0xfb   :  { %p1956_p5 = pnand %p1955_p4, %p1949_p1 }
  0xfd   :  { %1959 = shalt.err (!%p1956_p5)
}
  0xfe   :  { %s2153_s6 = smov 128   ;;  %s2154_s1 = smov 8  }
  0xff   :  { %134 = dma.hbm_to_vmem [thread:$0]  %s2618_s8, 2048, %s129_s25, [#allocation15], %s2153_s6, %s2153_s6, %s2154_s1  }
 0x100   :  { %s2155_s28 = smov [#allocation19]   ;;  %s2156_s22 = smov [#allocation22]  }
 0x101   :  { %s150_s0 = sshll.u32 %s2155_s28, 4  ;;  %s172_s9 = sshll.u32 %s2156_s22, 4  ;;  %s151_s0 = int_to_ptr.vmem [resolvable:$true] %s150_s0  ;;  %s173_s9 = int_to_ptr.vmem [resolvable:$true] %s172_s9 }
 0x102   :  { %s1960_s24 = scalar_lea.hbm %s2620_s10, 1024 }
 0x103   :  { %p1961_p6 = scmp.ne.s32.totalorder %s2620_s10, %s1960_s24  ;;  %p1964_p7 = scmp.lt.u32.totalorder %s1960_s24, %s2620_s10 }
 0x105   :  { %p1966_p8 = pnand %p1964_p7, %p1961_p6 }
 0x107   :  { %1969 = shalt.err (!%p1966_p8)
}
 0x108   :  { %s1970_s8 = scalar_lea.vmem %s151_s0, 1024  ;;  %p1975_p10 = scmp.lt.s32.totalorder %s151_s0, %s151_s0 }
 0x109   :  { %p1971_p9 = scmp.ne.s32.totalorder %s151_s0, %s1970_s8  ;;  %p1976_p11 = scmp.lt.s32.totalorder %s1970_s8, %s1970_s8 }
 0x10b   :  { %p1977_p12 = por %p1976_p11, %p1975_p10 }
 0x10d   :  { %p1978_p13 = pnand %p1977_p12, %p1971_p9 }
 0x10f   :  { %1981 = shalt.err (!%p1978_p13)
}
 0x110   :  { %156 = dma.hbm_to_vmem [thread:$0]  %s2620_s10, 1024, %s151_s0, [#allocation18], %s2148_s29, %s2148_s29, %s2149_s2  }
 0x111   :  { %s1982_s23 = scalar_lea.hbm %s2622_s12, 1024 }
 0x112   :  { %p1983_p0 = scmp.ne.s32.totalorder %s2622_s12, %s1982_s23  ;;  %p1986_p1 = scmp.lt.u32.totalorder %s1982_s23, %s2622_s12 }
 0x114   :  { %p1988_p2 = pnand %p1986_p1, %p1983_p0 }
 0x116   :  { %1991 = shalt.err (!%p1988_p2)
}
 0x117   :  { %s1992_s11 = scalar_lea.vmem %s173_s9, 1024  ;;  %p1997_p4 = scmp.lt.s32.totalorder %s173_s9, %s173_s9 }
 0x118   :  { %p1993_p3 = scmp.ne.s32.totalorder %s173_s9, %s1992_s11  ;;  %p1998_p5 = scmp.lt.s32.totalorder %s1992_s11, %s1992_s11 }
 0x11a   :  { %p1999_p6 = por %p1998_p5, %p1997_p4 }
 0x11c   :  { %p2000_p7 = pnand %p1999_p6, %p1993_p3 }
 0x11e   :  { %2003 = shalt.err (!%p2000_p7)
}
 0x11f   :  { %178 = dma.hbm_to_vmem [thread:$0]  %s2622_s12, 1024, %s173_s9, [#allocation21], %s2148_s29, %s2148_s29, %s2149_s2  }
 0x120   :  { %s2157_s0 = smov [#allocation25]   ;;  %s2158_s15 = smov [#allocation28]  }
 0x121   :  { %s194_s22 = sshll.u32 %s2157_s0, 4  ;;  %s216_s4 = sshll.u32 %s2158_s15, 4  ;;  %s195_s22 = int_to_ptr.vmem [resolvable:$true] %s194_s22  ;;  %s217_s4 = int_to_ptr.vmem [resolvable:$true] %s216_s4 }
 0x122   :  { %s2004_s3 = scalar_lea.hbm %s2624_s14, 1024 }
 0x123   :  { %p2005_p8 = scmp.ne.s32.totalorder %s2624_s14, %s2004_s3  ;;  %p2008_p9 = scmp.lt.u32.totalorder %s2004_s3, %s2624_s14 }
 0x125   :  { %p2010_p10 = pnand %p2008_p9, %p2005_p8 }
 0x127   :  { %2013 = shalt.err (!%p2010_p10)
}
 0x128   :  { %s2014_s12 = scalar_lea.vmem %s195_s22, 1024  ;;  %p2019_p12 = scmp.lt.s32.totalorder %s195_s22, %s195_s22 }
 0x129   :  { %p2015_p11 = scmp.ne.s32.totalorder %s195_s22, %s2014_s12  ;;  %p2020_p13 = scmp.lt.s32.totalorder %s2014_s12, %s2014_s12 }
 0x12b   :  { %p2021_p0 = por %p2020_p13, %p2019_p12 }
 0x12d   :  { %p2022_p1 = pnand %p2021_p0, %p2015_p11 }
 0x12f   :  { %2025 = shalt.err (!%p2022_p1)
}
 0x130   :  { %200 = dma.hbm_to_vmem [thread:$0]  %s2624_s14, 1024, %s195_s22, [#allocation24], %s2148_s29, %s2148_s29, %s2149_s2  }
 0x131   :  { %s2026_s23 = scalar_lea.hbm %s2626_s16, 1024 }
 0x132   :  { %p2027_p2 = scmp.ne.s32.totalorder %s2626_s16, %s2026_s23  ;;  %p2030_p3 = scmp.lt.u32.totalorder %s2026_s23, %s2626_s16 }
 0x134   :  { %p2032_p4 = pnand %p2030_p3, %p2027_p2 }
 0x136   :  { %2035 = shalt.err (!%p2032_p4)
}
 0x137   :  { %s2036_s11 = scalar_lea.vmem %s217_s4, 1024  ;;  %p2041_p6 = scmp.lt.s32.totalorder %s217_s4, %s217_s4 }
 0x138   :  { %p2037_p5 = scmp.ne.s32.totalorder %s217_s4, %s2036_s11  ;;  %p2042_p7 = scmp.lt.s32.totalorder %s2036_s11, %s2036_s11 }
 0x13a   :  { %p2043_p8 = por %p2042_p7, %p2041_p6 }
 0x13c   :  { %p2044_p9 = pnand %p2043_p8, %p2037_p5 }
 0x13e   :  { %2047 = shalt.err (!%p2044_p9)
}
 0x13f   :  { %222 = dma.hbm_to_vmem [thread:$0]  %s2626_s16, 1024, %s217_s4, [#allocation27], %s2148_s29, %s2148_s29, %s2149_s2  }
 0x140   :  { %s2159_s28 = smov [#allocation29]   ;;  %s2048_s24 = scalar_lea.hbm %s2627_s17, 16 }
 0x141   :  { %s229_s0 = sshll.u32 %s2159_s28, 4  ;;  %p2049_p10 = scmp.ne.s32.totalorder %s2627_s17, %s2048_s24  ;;  %s230_s0 = int_to_ptr.vmem [resolvable:$true] %s229_s0 }
 0x142   :  { %p2052_p11 = scmp.lt.u32.totalorder %s2048_s24, %s2627_s17 }
 0x144   :  { %p2054_p12 = pnand %p2052_p11, %p2049_p10 }
 0x146   :  { %2057 = shalt.err (!%p2054_p12)
}
 0x147   :  { %s2058_s8 = scalar_lea.vmem %s230_s0, 16  ;;  %s2062_s16 = scalar_lea.vmem %s230_s0, 32 }
 0x148   :  { %p2059_p13 = scmp.ne.s32.totalorder %s230_s0, %s2058_s8  ;;  %p2063_p0 = scmp.lt.s32.totalorder %s230_s0, %s230_s0 }
 0x149   :  { %p2064_p1 = scmp.lt.s32.totalorder %s2062_s16, %s2058_s8 }
 0x14b   :  { %p2065_p2 = por %p2064_p1, %p2063_p0 }
 0x14d   :  { %p2066_p3 = pnand %p2065_p2, %p2059_p13 }
 0x14f   :  { %2069 = shalt.err (!%p2066_p3)
}
 0x150   :  { %232 = dma.hbm_to_vmem [thread:$0]  %s2627_s17, 16, %s230_s0, [#allocation30]  }
 0x151   :  { %2114 = dma.done.wait [#allocation3], 64  }
 0x152   :  { %2115 = vsyncadd [#allocation3], 4294967232 }
 0x153   :  { %2116 = dma.done.wait [#allocation6], 1152  }
 0x154   :  { %2117 = vsyncadd [#allocation6], 4294966144 }
 0x155   :  { %2118 = dma.done.wait [#allocation9], 1040  }
 0x156   :  { %2119 = vsyncadd [#allocation9], 4294966256 }
 0x157   :  { %2120 = dma.done.wait [#allocation12], 1040  }
 0x158   :  { %2121 = vsyncadd [#allocation12], 4294966256 }
 0x159   :  { %2122 = dma.done.wait [#allocation15], 2064  }
 0x15a   :  { %2123 = vsyncadd [#allocation15], 4294965232 }
 0x15b   :  { %2124 = dma.done.wait [#allocation18], 1056  }
 0x15c   :  { %2125 = vsyncadd [#allocation18], 4294966240 }
 0x15d   :  { %2126 = dma.done.wait [#allocation21], 1040  }
 0x15e   :  { %2127 = vsyncadd [#allocation21], 4294966256 }
 0x15f   :  { %2128 = dma.done.wait [#allocation24], 1040  }
 0x160   :  { %2129 = vsyncadd [#allocation24], 4294966256 }
 0x161   :  { %2130 = dma.done.wait [#allocation27], 1040  }
 0x162   :  { %2131 = vsyncadd [#allocation27], 4294966256 }
 0x163   :  { %2132 = dma.done.wait [#allocation30], 16  }
 0x164   :  { %2133 = vsyncadd [#allocation30], 4294967280  ;;  %v2160_v0 = vmov 0.0   ;;  %vm2161_vm0 = vmmov 0   ;;  %v1592_v1 = vld [vmem:[#allocation7] sm:$0xff]   ;;  %v1593_v2 = vld [vmem:[#allocation7 + $0x8] sm:$0xff]  }
 0x165   :  { %1425 = vmatprep.subr.bf16.mxu0 %v2160_v0  ;;  %1441 = vmatprep.mubr.msk.bf16.mxu0 %vm2161_vm0, %v2160_v0  ;;  %v1594_v3 = vld [vmem:[#allocation7 + $0x10] sm:$0xff]   ;;  %v1600_v4 = vld [vmem:[#allocation10] sm:$0xff]   ;;  %v1595_v5 = vld [vmem:[#allocation7 + $0x18] sm:$0xff]   ;;  %v2162_v58 = vmov 0   ;;  %s2163_s17 = smov [#allocation32]  }
 0x166   :  { %1445 = vmatprep.subr.bf16.mxu1 %v2160_v0  ;;  %1461 = vmatprep.mubr.msk.bf16.mxu1 %vm2161_vm0, %v2160_v0  ;;  %v1601_v6 = vld [vmem:[#allocation10 + $0x8] sm:$0xff]   ;;  %v1596_v7 = vld [vmem:[#allocation7 + $0x20] sm:$0xff]   ;;  %v1602_v8 = vld [vmem:[#allocation10 + $0x10] sm:$0xff]   ;;  %s1260_s4 = sshll.u32 %s2163_s17, 4  ;;  %s1261_s4 = int_to_ptr.vmem [resolvable:$true] %s1260_s4 }
 0x167   :  { %1426 = vmatpush3.bf16.msra.mxu0 %v1592_v1  ;;  %1446 = vmatpush3.bf16.msra.mxu1 %v1600_v4  ;;  %v1597_v9 = vld [vmem:[#allocation7 + $0x28] sm:$0xff]   ;;  %v1603_v10 = vld [vmem:[#allocation10 + $0x18] sm:$0xff]   ;;  %v1598_v11 = vld [vmem:[#allocation7 + $0x30] sm:$0xff]   ;;  %s2070_s25 = scalar_lea.vmem %s1261_s4, 128  ;;  %p2075_p5 = scmp.lt.s32.totalorder %s1261_s4, %s1261_s4 }
 0x168   :  { %1427 = vmatprep.subr.bf16.mxu0 %v2160_v0  ;;  %1447 = vmatprep.subr.bf16.mxu1 %v2160_v0  ;;  %v1604_v12 = vld [vmem:[#allocation10 + $0x20] sm:$0xff]   ;;  %v1599_v13 = vld [vmem:[#allocation7 + $0x38] sm:$0xff]   ;;  %v1605_v14 = vld [vmem:[#allocation10 + $0x28] sm:$0xff]   ;;  %p2071_p4 = scmp.ne.s32.totalorder %s1261_s4, %s2070_s25  ;;  %p2076_p6 = scmp.lt.s32.totalorder %s2070_s25, %s2070_s25 }
 0x169   :  { %v288_v15 = vld [vmem:[#allocation2] sm:$0xf]  ;;  %v1607_v17 = vld [vmem:[#allocation10 + $0x38] sm:$0xff]   ;;  %v1608_v18 = vld [vmem:[#allocation13] sm:$0xff]  }
 0x16a   :  { %v1606_v16 = vld [vmem:[#allocation10 + $0x30] sm:$0xff]   ;;  %v1611_v21 = vld [vmem:[#allocation13 + $0x18] sm:$0xff]   ;;  %v1612_v22 = vld [vmem:[#allocation13 + $0x20] sm:$0xff]   ;;  %p2077_p7 = por %p2076_p6, %p2075_p5 }
 0x16b   :  { %1428 = vmatpush3.bf16.msra.mxu0 %v1593_v2  ;;  %1448 = vmatpush3.bf16.msra.mxu1 %v1601_v6  ;;  %v1609_v19 = vld [vmem:[#allocation13 + $0x8] sm:$0xff]   ;;  %v1610_v20 = vld [vmem:[#allocation13 + $0x10] sm:$0xff]   ;;  %v1282_v24 = vld [vmem:[#allocation8] ss:$0 sm:$0xff] }
 0x16c   :  { %1429 = vmatprep.subr.bf16.mxu0 %v2160_v0  ;;  %1449 = vmatprep.subr.bf16.mxu1 %v2160_v0  ;;  %v1613_v23 = vld [vmem:[#allocation13 + $0x28] sm:$0xff]   ;;  %v1614_v32 = vld [vmem:[#allocation13 + $0x30] sm:$0xff]   ;;  %v1615_v33 = vld [vmem:[#allocation13 + $0x38] sm:$0xff]   ;;  %p2078_p8 = pnand %p2077_p7, %p2071_p4 }
 0x16d   :  { %v1616_v34 = vld [vmem:[#allocation16] ss:$8 sps:$4 sm:$0xff]   ;;  %v1618_v35 = vld [vmem:[#allocation16 + $0x4] ss:$8 sps:$4 sm:$0xff]   ;;  %v1621_v36 = vld [vmem:[#allocation16 + $0x14] ss:$8 sps:$4 sm:$0xff]  }
 0x16e   :  { %v1619_v37 = vld [vmem:[#allocation16 + $0x10] ss:$8 sps:$4 sm:$0xff]   ;;  %v1624_v38 = vld [vmem:[#allocation16 + $0x24] ss:$8 sps:$4 sm:$0xff]   ;;  %v1622_v39 = vld [vmem:[#allocation16 + $0x20] ss:$8 sps:$4 sm:$0xff]  }
 0x16f   :  { %1430 = vmatpush3.bf16.msra.mxu0 %v1594_v3  ;;  %1450 = vmatpush3.bf16.msra.mxu1 %v1602_v8  ;;  %v1627_v40 = vld [vmem:[#allocation16 + $0x34] ss:$8 sps:$4 sm:$0xff]   ;;  %v1625_v41 = vld [vmem:[#allocation16 + $0x30] ss:$8 sps:$4 sm:$0xff]   ;;  %v1630_v42 = vld [vmem:[#allocation16 + $0x44] ss:$8 sps:$4 sm:$0xff]  }
 0x170   :  { %1431 = vmatprep.subr.bf16.mxu0 %v2160_v0  ;;  %1451 = vmatprep.subr.bf16.mxu1 %v2160_v0  ;;  %v1628_v43 = vld [vmem:[#allocation16 + $0x40] ss:$8 sps:$4 sm:$0xff]   ;;  %v1633_v44 = vld [vmem:[#allocation16 + $0x54] ss:$8 sps:$4 sm:$0xff]   ;;  %v1631_v45 = vld [vmem:[#allocation16 + $0x50] ss:$8 sps:$4 sm:$0xff]  }
 0x171   :  { %v1636_v46 = vld [vmem:[#allocation16 + $0x64] ss:$8 sps:$4 sm:$0xff]   ;;  %v1634_v47 = vld [vmem:[#allocation16 + $0x60] ss:$8 sps:$4 sm:$0xff]   ;;  %v1291_v48 = vld [vmem:[#allocation11] ss:$0 sm:$0xff] }
 0x172   :  { %v1639_v56 = vld [vmem:[#allocation16 + $0x74] ss:$8 sps:$4 sm:$0xff]   ;;  %v1637_v57 = vld [vmem:[#allocation16 + $0x70] ss:$8 sps:$4 sm:$0xff]   ;;  %v1640_v59 = vld [vmem:[#allocation19] sm:$0xff]  }
 0x173   :  { %1432 = vmatpush3.bf16.msra.mxu0 %v1595_v5  ;;  %1452 = vmatpush3.bf16.msra.mxu1 %v1603_v10  ;;  %v1641_v60 = vld [vmem:[#allocation19 + $0x8] sm:$0xff]   ;;  %v1300_v61 = vld [vmem:[#allocation14] ss:$0 sm:$0xff]  ;;  %v1642_v6 = vld [vmem:[#allocation19 + $0x10] sm:$0xff]  }
 0x174   :  { %1433 = vmatprep.subr.bf16.mxu0 %v2160_v0  ;;  %1453 = vmatprep.subr.bf16.mxu1 %v2160_v0  ;;  %v1644_v8 = vld [vmem:[#allocation19 + $0x20] sm:$0xff]   ;;  %v1646_v10 = vld [vmem:[#allocation19 + $0x30] sm:$0xff]  }
 0x177   :  { %1434 = vmatpush3.bf16.msra.mxu0 %v1596_v7  ;;  %1454 = vmatpush3.bf16.msra.mxu1 %v1604_v12  ;;  %v1643_v7 = vld [vmem:[#allocation19 + $0x18] sm:$0xff]   ;;  %v646_v12 = vlaneseq }
 0x178   :  { %1435 = vmatprep.subr.bf16.mxu0 %v2160_v0  ;;  %1455 = vmatprep.subr.bf16.mxu1 %v2160_v0 }
 0x17b   :  { %1436 = vmatpush3.bf16.msra.mxu0 %v1597_v9  ;;  %1456 = vmatpush3.bf16.msra.mxu1 %v1605_v14  ;;  %v1645_v9 = vld [vmem:[#allocation19 + $0x28] sm:$0xff]  }
 0x17c   :  { %1437 = vmatprep.subr.bf16.mxu0 %v2160_v0  ;;  %1457 = vmatprep.subr.bf16.mxu1 %v2160_v0 }
 0x17f   :  { %1438 = vmatpush3.bf16.msra.mxu0 %v1598_v11  ;;  %1458 = vmatpush3.bf16.msra.mxu1 %v1606_v16  ;;  %v1647_v11 = vld [vmem:[#allocation19 + $0x38] sm:$0xff]  }
 0x180   :  { %1439 = vmatprep.subr.bf16.mxu0 %v2160_v0  ;;  %1459 = vmatprep.subr.bf16.mxu1 %v2160_v0 }
 0x183   :  { %1440 = vmatpush3.bf16.msra.mxu0 %v1599_v13  ;;  %1460 = vmatpush3.bf16.msra.mxu1 %v1607_v17  ;;  %v647_v13 = vshrl.u32 %v646_v12, 7 }
 0x184   :  { %1465 = vmatprep.subr.bf16.mxu0 %v2160_v0  ;;  %736 = vmatprep.subr.bf16.mxu1 %v1618_v35 }
 0x185   :  { %v652_v14 = vsub.s32 1, %v647_v13 }
 0x186   :  { %1442 = vmatmul.mubr.bf16.vlgmr.msra.gmra.mrb[0].mxu0 %v288_v15  ;;  %v644_v15 = vld [vmem:[#allocation17] sm:$0x3] }
 0x187   :  { %1481 = vmatprep.mubr.msk.bf16.mxu0 %vm2161_vm0, %v2160_v0  ;;  %1466 = vmatpush3.bf16.msra.mxu0 %v1608_v18  ;;  %v653_v16 = vrot.slane %v644_v15, %v652_v14  ;;  %v1670_v14 = vld [vmem:[#allocation28 + $0x30] sm:$0xff]  }
 0x188   :  { %1467 = vmatprep.subr.bf16.mxu0 %v2160_v0 }
 0x18b   :  { %1468 = vmatpush3.bf16.msra.mxu0 %v1609_v19 }
 0x18c   :  { %1469 = vmatprep.subr.bf16.mxu0 %v2160_v0 }
 0x18f   :  { %1470 = vmatpush3.bf16.msra.mxu0 %v1610_v20 }
 0x190   :  { %1471 = vmatprep.subr.bf16.mxu0 %v2160_v0 }
 0x193   :  { %1472 = vmatpush3.bf16.msra.mxu0 %v1611_v21 }
 0x194   :  { %1473 = vmatprep.subr.bf16.mxu0 %v2160_v0 }
 0x197   :  { %1474 = vmatpush3.bf16.msra.mxu0 %v1612_v22 }
 0x198   :  { %1475 = vmatprep.subr.bf16.mxu0 %v2160_v0 }
 0x19b   :  { %1476 = vmatpush3.bf16.msra.mxu0 %v1613_v23  ;;  %v648_v23 = vsub.s32 0, %v647_v13 }
 0x19c   :  { %1477 = vmatprep.subr.bf16.mxu0 %v2160_v0 }
 0x19f   :  { %1478 = vmatpush3.bf16.msra.mxu0 %v1614_v32 }
 0x1a0   :  { %1479 = vmatprep.subr.bf16.mxu0 %v2160_v0 }
 0x1a3   :  { %1480 = vmatpush3.bf16.msra.mxu0 %v1615_v33 }
 0x1a4   :  { %1485 = vmatprep.subr.bf16.mxu0 %v2160_v0 }
 0x259   :  { %v394_v25 = vpop.f32.mrb[0].mxu0 }
 0x25a   :  { %v395_v26 = vadd.f32 %v1282_v24, %v394_v25  ;;  %v1443_v27 = vpop.f32.mrb[1].mxu0  ;;  %v649_v24 = vrot.slane %v644_v15, %v648_v23  ;;  %v1671_v15 = vld [vmem:[#allocation28 + $0x38] sm:$0xff]  }
 0x25b   :  { %v397_v28 = vpop.f32.mrb[2].mxu0 }
 0x25c   :  { %v400_v29 = vmax.f32 %v395_v26, 0.0  ;;  %v1444_v30 = vpop.f32.mrb[3].mxu0  ;;  %v779_v26 = vld [vmem:[#allocation5] sm:$0xff] }
 0x25e   :  { %v401_v31 = vpack.c.bf16 %v400_v29, %v400_v29 }
 0x260   :  { %1462 = vmatmul.mubr.bf16.vlgmr.msra.gmra.mrb[0].mxu1 %v401_v31 }
 0x261   :  { %737 = vmatpush1.bf16.msra.mxu1 %v1616_v34  ;;  %768 = vmatprep.mubr.bf16.mxu1 %v2162_v58 }
 0x262   :  { %738 = vmatprep.subr.bf16.mxu1 %v1621_v36 }
 0x265   :  { %739 = vmatpush1.bf16.msra.mxu1 %v1619_v37 }
 0x266   :  { %740 = vmatprep.subr.bf16.mxu1 %v1624_v38  ;;  %v1648_v38 = vld [vmem:[#allocation22] sm:$0xff]  }
 0x269   :  { %741 = vmatpush1.bf16.msra.mxu1 %v1622_v39  ;;  %v1649_v39 = vld [vmem:[#allocation22 + $0x8] sm:$0xff]  }
 0x26a   :  { %742 = vmatprep.subr.bf16.mxu1 %v1627_v40  ;;  %v1650_v40 = vld [vmem:[#allocation22 + $0x10] sm:$0xff]  }
 0x26d   :  { %743 = vmatpush1.bf16.msra.mxu1 %v1625_v41  ;;  %v1651_v41 = vld [vmem:[#allocation22 + $0x18] sm:$0xff]  }
 0x26e   :  { %744 = vmatprep.subr.bf16.mxu1 %v1630_v42  ;;  %v1652_v42 = vld [vmem:[#allocation22 + $0x20] sm:$0xff]  }
 0x271   :  { %745 = vmatpush1.bf16.msra.mxu1 %v1628_v43  ;;  %v1653_v43 = vld [vmem:[#allocation22 + $0x28] sm:$0xff]  }
 0x272   :  { %746 = vmatprep.subr.bf16.mxu1 %v1633_v44  ;;  %v1654_v44 = vld [vmem:[#allocation22 + $0x30] sm:$0xff]  }
 0x275   :  { %747 = vmatpush1.bf16.msra.mxu1 %v1631_v45  ;;  %v1655_v45 = vld [vmem:[#allocation22 + $0x38] sm:$0xff]  }
 0x276   :  { %748 = vmatprep.subr.bf16.mxu1 %v1636_v46  ;;  %v1656_v46 = vld [vmem:[#allocation25] sm:$0xff]  }
 0x279   :  { %749 = vmatpush1.bf16.msra.mxu1 %v1634_v47  ;;  %v1657_v47 = vld [vmem:[#allocation25 + $0x8] sm:$0xff]  }
 0x27a   :  { %750 = vmatprep.subr.bf16.mxu1 %v1639_v56 }
 0x27d   :  { %751 = vmatpush1.bf16.msra.mxu1 %v1637_v57 }
 0x27e   :  { %1505 = vmatprep.subr.bf16.mxu1 %v2160_v0 }
 0x333   :  { %v507_v49 = vpop.f32.mrb[0].mxu1 }
 0x334   :  { %v508_v50 = vadd.f32 %v1291_v48, %v507_v49  ;;  %v1463_v51 = vpop.f32.mrb[1].mxu1  ;;  %v1658_v48 = vld [vmem:[#allocation25 + $0x10] sm:$0xff]   ;;  %v1659_v49 = vld [vmem:[#allocation25 + $0x18] sm:$0xff]  }
 0x335   :  { %v510_v52 = vpop.f32.mrb[2].mxu1  ;;  %v1661_v51 = vld [vmem:[#allocation25 + $0x28] sm:$0xff]  }
 0x336   :  { %v513_v53 = vmax.f32 %v508_v50, 0.0  ;;  %v1464_v54 = vpop.f32.mrb[3].mxu1  ;;  %v1660_v50 = vld [vmem:[#allocation25 + $0x20] sm:$0xff]  }
 0x338   :  { %v514_v55 = vpack.c.bf16 %v513_v53, %v513_v53  ;;  %v1326_v53 = vld [vmem:[#allocation20] ss:$0 sm:$0xff] }
 0x33a   :  { %1482 = vmatmul.mubr.bf16.vlgmr.msra.gmra.mrb[4].mxu0 %v514_v55 }
 0x33b   :  { %1501 = vmatprep.mubr.msk.bf16.mxu0 %vm2161_vm0, %v2160_v0  ;;  %1486 = vmatpush3.bf16.msra.mxu0 %v1640_v59 }
 0x33c   :  { %1487 = vmatprep.subr.bf16.mxu0 %v2160_v0 }
 0x33f   :  { %1488 = vmatpush3.bf16.msra.mxu0 %v1641_v60 }
 0x340   :  { %1489 = vmatprep.subr.bf16.mxu0 %v2160_v0 }
 0x343   :  { %1490 = vmatpush3.bf16.msra.mxu0 %v1642_v6  ;;  %v1335_v6 = vld [vmem:[#allocation23] ss:$0 sm:$0xff] }
 0x344   :  { %1491 = vmatprep.subr.bf16.mxu0 %v2160_v0 }
 0x347   :  { %1492 = vmatpush3.bf16.msra.mxu0 %v1643_v7 }
 0x348   :  { %1493 = vmatprep.subr.bf16.mxu0 %v2160_v0 }
 0x34b   :  { %1494 = vmatpush3.bf16.msra.mxu0 %v1644_v8 }
 0x34c   :  { %1495 = vmatprep.subr.bf16.mxu0 %v2160_v0 }
 0x34f   :  { %1496 = vmatpush3.bf16.msra.mxu0 %v1645_v9 }
 0x350   :  { %1497 = vmatprep.subr.bf16.mxu0 %v2160_v0 }
 0x353   :  { %1498 = vmatpush3.bf16.msra.mxu0 %v1646_v10 }
 0x354   :  { %1499 = vmatprep.subr.bf16.mxu0 %v2160_v0 }
 0x357   :  { %1500 = vmatpush3.bf16.msra.mxu0 %v1647_v11 }
 0x358   :  { %1525 = vmatprep.subr.bf16.mxu0 %v2160_v0 }
 0x40d   :  { %v620_v62 = vpop.f32.mrb[4].mxu0 }
 0x40e   :  { %v621_v63 = vadd.f32 %v1300_v61, %v620_v62  ;;  %v1483_v1 = vpop.f32.mrb[5].mxu0  ;;  %v1662_v61 = vld [vmem:[#allocation25 + $0x30] sm:$0xff]   ;;  %v1663_v62 = vld [vmem:[#allocation25 + $0x38] sm:$0xff]  }
 0x40f   :  { %v623_v2 = vpop.f32.mrb[6].mxu0  ;;  %v1665_v1 = vld [vmem:[#allocation28 + $0x8] sm:$0xff]  }
 0x410   :  { %v626_v3 = vmax.f32 %v621_v63, 0.0  ;;  %v1484_v4 = vpop.f32.mrb[7].mxu0  ;;  %v1664_v63 = vld [vmem:[#allocation28] sm:$0xff]   ;;  %v1666_v2 = vld [vmem:[#allocation28 + $0x10] sm:$0xff]  }
 0x411   :  { %v1668_v4 = vld [vmem:[#allocation28 + $0x20] sm:$0xff]  }
 0x412   :  { %v627_v5 = vpack.c.bf16 %v626_v3, %v626_v3  ;;  %v1667_v3 = vld [vmem:[#allocation28 + $0x18] sm:$0xff]  }
 0x414   :  { %769 = vmatmul.mubr.bf16.vlgmr.msra.gmra.mrb[4].mxu1 %v627_v5  ;;  %v1669_v5 = vld [vmem:[#allocation28 + $0x28] sm:$0xff]  }
 0x415   :  { %1521 = vmatprep.mubr.msk.bf16.mxu1 %vm2161_vm0, %v2160_v0  ;;  %1506 = vmatpush3.bf16.msra.mxu1 %v1648_v38 }
 0x416   :  { %1507 = vmatprep.subr.bf16.mxu1 %v2160_v0 }
 0x419   :  { %1508 = vmatpush3.bf16.msra.mxu1 %v1649_v39 }
 0x41a   :  { %1509 = vmatprep.subr.bf16.mxu1 %v2160_v0 }
 0x41d   :  { %1510 = vmatpush3.bf16.msra.mxu1 %v1650_v40 }
 0x41e   :  { %1511 = vmatprep.subr.bf16.mxu1 %v2160_v0 }
 0x421   :  { %1512 = vmatpush3.bf16.msra.mxu1 %v1651_v41 }
 0x422   :  { %1513 = vmatprep.subr.bf16.mxu1 %v2160_v0 }
 0x425   :  { %1514 = vmatpush3.bf16.msra.mxu1 %v1652_v42 }
 0x426   :  { %1515 = vmatprep.subr.bf16.mxu1 %v2160_v0 }
 0x429   :  { %1516 = vmatpush3.bf16.msra.mxu1 %v1653_v43 }
 0x42a   :  { %1517 = vmatprep.subr.bf16.mxu1 %v2160_v0 }
 0x42d   :  { %1518 = vmatpush3.bf16.msra.mxu1 %v1654_v44 }
 0x42e   :  { %1519 = vmatprep.subr.bf16.mxu1 %v2160_v0 }
 0x431   :  { %1520 = vmatpush3.bf16.msra.mxu1 %v1655_v45 }
 0x432   :  { %1545 = vmatprep.subr.bf16.mxu1 %v2160_v0 }
 0x4e7   :  { %v770_v17 = vpop.f32.mrb[4].mxu1 }
 0x4e8   :  { %v772_v18 = vpop.f32.mrb[5].mxu1  ;;  %v771_v25 = vadd.f32 %v770_v17, %v649_v24 }
 0x4e9   :  { %v773_v19 = vadd.f32 %v772_v18, %v653_v16  ;;  %v774_v20 = vpop.f32.mrb[6].mxu1  ;;  %v1344_v16 = vld [vmem:[#allocation26] ss:$0 sm:$0xff] }
 0x4ea   :  { %v775_v21 = vpop.f32.mrb[7].mxu1  ;;  %v782_v28 = vmul.f32 %v771_v25, %v771_v25 }
 0x4eb   :  { %v777_v22 = vmul.f32 1.442695, %v773_v19  ;;  %v785_v31 = vmul.f32 2.0, %v773_v19 }
 0x4ed   :  { %1672 = vpow2.f32 %v777_v22 }
 0x4f7   :  { %v1673_v27 = vpop.eup %1672 }
 0x4f8   :  { %v780_v29 = vmul.f32 %v1673_v27, %v779_v26  ;;  %v783_v30 = vmul.f32 %v1673_v27, %v1673_v27 }
 0x4fa   :  { %v781_v32 = vadd.f32 %v780_v29, %v771_v25  ;;  %v784_v33 = vadd.f32 %v783_v30, %v782_v28 }
 0x4fc   :  { %v792_v34 = vpack.c.bf16 %v781_v32, %v781_v32  ;;  %v786_v35 = vsub.f32 %v784_v33, %v785_v31 }
 0x4fe   :  { %1502 = vmatmul.mubr.bf16.vlgmr.msra.gmra.mrb[8].mxu0 %v792_v34  ;;  %v1325_v36 = vadd.f32 -1.0, %v786_v35 }
 0x4ff   :  { %1541 = vmatprep.mubr.msk.bf16.mxu0 %vm2161_vm0, %v2160_v0  ;;  %1526 = vmatpush3.bf16.msra.mxu0 %v1656_v46 }
 0x500   :  { %v788_v37 = vmul.f32 0.5, %v1325_v36  ;;  %1527 = vmatprep.subr.bf16.mxu0 %v2160_v0 }
 0x502   :  { %789 = vadd.xlane.f32.xlu0 %v788_v37 }
 0x503   :  { %1528 = vmatpush3.bf16.msra.mxu0 %v1657_v47 }
 0x504   :  { %1529 = vmatprep.subr.bf16.mxu0 %v2160_v0 }
 0x507   :  { %1530 = vmatpush3.bf16.msra.mxu0 %v1658_v48 }
 0x508   :  { %1531 = vmatprep.subr.bf16.mxu0 %v2160_v0 }
 0x50b   :  { %1532 = vmatpush3.bf16.msra.mxu0 %v1659_v49 }
 0x50c   :  { %1533 = vmatprep.subr.bf16.mxu0 %v2160_v0 }
 0x50f   :  { %1534 = vmatpush3.bf16.msra.mxu0 %v1660_v50 }
 0x510   :  { %1535 = vmatprep.subr.bf16.mxu0 %v2160_v0 }
 0x513   :  { %1536 = vmatpush3.bf16.msra.mxu0 %v1661_v51 }
 0x514   :  { %1537 = vmatprep.subr.bf16.mxu0 %v2160_v0 }
 0x517   :  { %1538 = vmatpush3.bf16.msra.mxu0 %v1662_v61 }
 0x518   :  { %1539 = vmatprep.subr.bf16.mxu0 %v2160_v0 }
 0x51b   :  { %1540 = vmatpush3.bf16.msra.mxu0 %v1663_v62 }
 0x58f   :  { %v790_v52 = vpop.xlane.xlu0 %789 }
 0x590   :  { %791 = vst [vmem:[#allocation32] sm:$0xff] %v790_v52 }
 0x5d1   :  { %v898_v54 = vpop.f32.mrb[8].mxu0 }
 0x5d2   :  { %v899_v55 = vadd.f32 %v1326_v53, %v898_v54  ;;  %v1503_v56 = vpop.f32.mrb[9].mxu0 }
 0x5d3   :  { %v901_v57 = vpop.f32.mrb[10].mxu0 }
 0x5d4   :  { %v904_v58 = vmax.f32 %v899_v55, 0.0  ;;  %v1504_v59 = vpop.f32.mrb[11].mxu0 }
 0x5d6   :  { %v905_v60 = vpack.c.bf16 %v904_v58, %v904_v58 }
 0x5d8   :  { %1522 = vmatmul.mubr.bf16.vlgmr.msra.gmra.mrb[8].mxu1 %v905_v60 }
 0x5d9   :  { %1561 = vmatprep.mubr.msk.bf16.mxu1 %vm2161_vm0, %v2160_v0  ;;  %1546 = vmatpush3.bf16.msra.mxu1 %v1664_v63 }
 0x5da   :  { %1547 = vmatprep.subr.bf16.mxu1 %v2160_v0 }
 0x5dd   :  { %1548 = vmatpush3.bf16.msra.mxu1 %v1665_v1 }
 0x5de   :  { %1549 = vmatprep.subr.bf16.mxu1 %v2160_v0 }
 0x5e1   :  { %1550 = vmatpush3.bf16.msra.mxu1 %v1666_v2 }
 0x5e2   :  { %1551 = vmatprep.subr.bf16.mxu1 %v2160_v0 }
 0x5e5   :  { %1552 = vmatpush3.bf16.msra.mxu1 %v1667_v3 }
 0x5e6   :  { %1553 = vmatprep.subr.bf16.mxu1 %v2160_v0 }
 0x5e9   :  { %1554 = vmatpush3.bf16.msra.mxu1 %v1668_v4 }
 0x5ea   :  { %1555 = vmatprep.subr.bf16.mxu1 %v2160_v0 }
 0x5ed   :  { %1556 = vmatpush3.bf16.msra.mxu1 %v1669_v5 }
 0x5ee   :  { %1557 = vmatprep.subr.bf16.mxu1 %v2160_v0 }
 0x5f1   :  { %1558 = vmatpush3.bf16.msra.mxu1 %v1670_v14 }
 0x5f2   :  { %1559 = vmatprep.subr.bf16.mxu1 %v2160_v0 }
 0x5f5   :  { %1560 = vmatpush3.bf16.msra.mxu1 %v1671_v15 }
 0x6ab   :  { %v1011_v7 = vpop.f32.mrb[8].mxu1 }
 0x6ac   :  { %v1012_v8 = vadd.f32 %v1335_v6, %v1011_v7  ;;  %v1523_v9 = vpop.f32.mrb[9].mxu1 }
 0x6ad   :  { %v1014_v10 = vpop.f32.mrb[10].mxu1 }
 0x6ae   :  { %v1017_v11 = vmax.f32 %v1012_v8, 0.0  ;;  %v1524_v12 = vpop.f32.mrb[11].mxu1 }
 0x6b0   :  { %v1018_v13 = vpack.c.bf16 %v1017_v11, %v1017_v11 }
 0x6b2   :  { %1542 = vmatmul.mubr.bf16.vlgmr.msra.gmra.mrb[12].mxu0 %v1018_v13 }
 0x785   :  { %v1124_v17 = vpop.f32.mrb[12].mxu0 }
 0x786   :  { %v1125_v18 = vadd.f32 %v1344_v16, %v1124_v17  ;;  %v1543_v19 = vpop.f32.mrb[13].mxu0 }
 0x787   :  { %v1127_v20 = vpop.f32.mrb[14].mxu0 }
 0x788   :  { %v1130_v21 = vmax.f32 %v1125_v18, 0.0  ;;  %v1544_v22 = vpop.f32.mrb[15].mxu0 }
 0x78a   :  { %v1131_v23 = vpack.c.bf16 %v1130_v21, %v1130_v21 }
 0x78c   :  { %1562 = vmatmul.mubr.bf16.vlgmr.msra.gmra.mrb[12].mxu1 %v1131_v23 }
 0x78d   :  { %2081 = shalt.err (!%p2078_p8)
}
 0x78e   :  { %s2082_s13 = scalar_lea.hbm %s2629_s19, 128 }
 0x78f   :  { %p2083_p9 = scmp.ne.s32.totalorder %s2629_s19, %s2082_s13  ;;  %p2086_p10 = scmp.lt.u32.totalorder %s2082_s13, %s2629_s19 }
 0x791   :  { %p2088_p11 = pnand %p2086_p10, %p2083_p9 }
 0x793   :  { %2091 = shalt.err (!%p2088_p11)
}
 0x794   :  { %1263 = dma.vmem_to_hbm [thread:$0]  %s1261_s4, 128, %s2629_s19, [#allocation33]   ;;  %v1353_v0 = vld [vmem:[#allocation29] ss:$0 sm:$0xff] }
 0x795   :  { %s2164_s21 = smov [#allocation31]  }
 0x796   :  { %s1250_s11 = sshll.u32 %s2164_s21, 4  ;;  %s1251_s11 = int_to_ptr.vmem [resolvable:$true] %s1250_s11 }
 0x797   :  { %s2092_s14 = scalar_lea.vmem %s1251_s11, 128  ;;  %p2097_p13 = scmp.lt.s32.totalorder %s1251_s11, %s1251_s11 }
 0x798   :  { %p2093_p12 = scmp.ne.s32.totalorder %s1251_s11, %s2092_s14  ;;  %p2098_p0 = scmp.lt.s32.totalorder %s2092_s14, %s2092_s14 }
 0x79a   :  { %p2099_p1 = por %p2098_p0, %p2097_p13 }
 0x79c   :  { %p2100_p2 = pnand %p2099_p1, %p2093_p12 }
 0x85f   :  { %v1237_v24 = vpop.f32.mrb[12].mxu1 }
 0x860   :  { %v1238_v25 = vadd.f32 %v1353_v0, %v1237_v24  ;;  %v1563_v26 = vpop.f32.mrb[13].mxu1 }
 0x861   :  { %v1240_v27 = vpop.f32.mrb[14].mxu1 }
 0x862   :  { %1243 = vst [vmem:[#allocation31] sm:$0xff] %v1238_v25  ;;  %v1564_v28 = vpop.f32.mrb[15].mxu1 }
 0x863   :  { %2103 = shalt.err (!%p2100_p2)
}
 0x864   :  { %s2104_s19 = scalar_lea.hbm %s2628_s18, 128 }
 0x865   :  { %p2105_p3 = scmp.ne.s32.totalorder %s2628_s18, %s2104_s19  ;;  %p2108_p4 = scmp.lt.u32.totalorder %s2104_s19, %s2628_s18 }
 0x867   :  { %p2110_p5 = pnand %p2108_p4, %p2105_p3 }
 0x869   :  { %2113 = shalt.err (!%p2110_p5)
}
 0x86a   :  { %1253 = dma.vmem_to_hbm [thread:$0]  %s1251_s11, 128, %s2628_s18, [#allocation4]  }
 0x86b   :  { %2134 = dma.done.wait [#allocation4], 128  }
 0x86c   :  { %2135 = vsyncadd [#allocation4], 4294967168 }
 0x86d   :  { %2136 = dma.done.wait [#allocation33], 128  }
 0x86e   :  { %2137 = vsyncadd [#allocation33], 4294967168 }
 0x86f   :  { %1270 = vsyncpa [#allocation3], 1 }
 0x870   :  { %1271 = vsyncpa [#allocation6], 1 }
 0x871   :  { %1272 = vsyncpa [#allocation9], 1 }
 0x872   :  { %1273 = vsyncpa [#allocation12], 1 }
 0x873   :  { %1274 = vsyncpa [#allocation15], 1 }
 0x874   :  { %1275 = vsyncpa [#allocation18], 1 }
 0x875   :  { %1276 = vsyncpa [#allocation21], 1 }
 0x876   :  { %1277 = vsyncpa [#allocation24], 1 }
 0x877   :  { %1278 = vsyncpa [#allocation27], 1 }
 0x878   :  { %1279 = vsyncpa [#allocation30], 1 }
 0x879   :  { %1280 = vsyncpa [#allocation4], 1 }
 0x87a   :  { %1281 = vsyncpa [#allocation33], 1 }

</bundles_post_ra>
